<compile_context>
chip_gen: v7x
topology: tpu7x:2x2x1
jax: 0.10.0
libtpu: 0.0.40
codegen_flags: <defaults>
</compile_context>

<pallas_src>
import math
import numpy as np
import jax
import jax.numpy as jnp
from jax.experimental import pallas as pl
from jax.experimental.pallas import tpu as pltpu

# ---- small, TPU-friendly config (consistent with the module's shape logic) ----
B = 2          # batch
S = 8          # seq len
H = 128        # hidden_size
NH = 4         # num_attention_heads
NKV = 2        # num_key_value_heads
HD = H // NH   # head_dim = 32
I = 256        # intermediate_size
EPS = 1e-6
ROPE_THETA = 10000.0
N_REP = NH // NKV

# TODO(synk): past_key_value / use_cache, output_attentions and attention_dropout (p=0.0)
#             paths of the PyTorch module are not implemented (inference forward only).


# --------------------------- fused Pallas kernel -----------------------------

def decoder_layer_kernel(x_ref, ln1_ref,
                         wq_ref, wqr_ref, wk_ref, wkr_ref, wv_ref, wo_ref,
                         cos_ref, sin_ref,
                         ln2_ref, wg_ref, wu_ref, wd_ref,
                         o_ref):
    """Whole decoder layer for one batch element (S, H)."""
    x = x_ref[0]                                      # (S, H) residual

    # ---- input RMSNorm (fp32) ----
    var = jnp.mean(x * x, axis=-1, keepdims=True)
    xn = (x * jax.lax.rsqrt(var + EPS)) * ln1_ref[0]

    # ---- q/k/v projections (weights pre-transposed; wq pre-scaled by 1/sqrt(HD);
    #      rotate_half folded into wqr/wkr columns host-side) ----
    q  = jnp.dot(xn, wq_ref[...],  preferred_element_type=jnp.float32)   # (S, NH*HD)
    qr = jnp.dot(xn, wqr_ref[...], preferred_element_type=jnp.float32)   # rotate_half(q)
    k  = jnp.dot(xn, wk_ref[...],  preferred_element_type=jnp.float32)   # (S, NKV*HD)
    kr = jnp.dot(xn, wkr_ref[...], preferred_element_type=jnp.float32)   # rotate_half(k)
    v  = jnp.dot(xn, wv_ref[...],  preferred_element_type=jnp.float32)   # (S, NKV*HD)

    # ---- RoPE on the full-width tensors (tables tiled per head host-side) ----
    cos = cos_ref[...]                                # (S, NH*HD)
    sin = sin_ref[...]
    KW = NKV * HD
    q_rope = q * cos + qr * sin
    k_rope = k * cos[:, :KW] + kr * sin[:, :KW]

    # ---- causal mask built in-kernel (rows pack N_REP query heads: pos = row % S) ----
    qpos = jax.lax.rem(jax.lax.broadcasted_iota(jnp.int32, (N_REP * S, S), 0), S)
    kpos = jax.lax.broadcasted_iota(jnp.int32, (N_REP * S, S), 1)
    causal = jnp.where(kpos <= qpos, 0.0, -1e9).astype(jnp.float32)

    # ---- GQA attention: one packed score matmul + softmax per kv head ----
    parts = []
    for g in range(NKV):
        heads = [N_REP * g + r for r in range(N_REP)]
        qg = jnp.concatenate(
            [q_rope[:, h * HD:(h + 1) * HD] for h in heads], axis=0)      # (N_REP*S, HD)
        kg = k_rope[:, g * HD:(g + 1) * HD]                               # (S, HD)
        vg = v[:, g * HD:(g + 1) * HD]                                    # (S, HD)
        s = jax.lax.dot_general(qg, kg, (((1,), (1,)), ((), ())),
                                preferred_element_type=jnp.float32)       # (N_REP*S, S)
        s = s + causal
        s = s - jnp.max(s, axis=-1, keepdims=True)
        p = jnp.exp(s)
        p = p * pl.reciprocal(jnp.sum(p, axis=-1, keepdims=True), approx=False)
        parts.append(jnp.dot(p, vg, preferred_element_type=jnp.float32))  # (N_REP*S, HD)

    attn = jnp.concatenate(
        [pg[r * S:(r + 1) * S] for pg in parts for r in range(N_REP)], axis=-1)  # (S, NH*HD)

    # ---- o_proj + residual ----
    h1 = x + jnp.dot(attn, wo_ref[...], preferred_element_type=jnp.float32)

    # ---- post-attention RMSNorm + SwiGLU MLP + residual ----
    var2 = jnp.mean(h1 * h1, axis=-1, keepdims=True)
    hn = (h1 * jax.lax.rsqrt(var2 + EPS)) * ln2_ref[0]
    gate = jnp.dot(hn, wg_ref[...], preferred_element_type=jnp.float32)   # (S, I)
    up = jnp.dot(hn, wu_ref[...], preferred_element_type=jnp.float32)     # (S, I)
    act = (gate * jax.nn.sigmoid(gate)) * up                              # SiLU(g) * u
    o_ref[0] = h1 + jnp.dot(act, wd_ref[...], preferred_element_type=jnp.float32)


# --------------------------- wrapper / host-side prep -------------------------

def prep_params(ln1, wq, wk, wv, wo, ln2, wg, wu, wd, cos, sin):
    """Host-side, one-time parameter layout: transpose, fold 1/sqrt(HD) into wq,
    fold the rotate_half permutation+sign into extra weight matrices, tile RoPE tables."""
    half = HD // 2

    def fold_rotate_half_cols(w_t, n_heads):
        # new col i (i<half) = -col(i+half) ; new col i (i>=half) = +col(i-half), per head block
        w3 = w_t.reshape(H, n_heads, HD)
        return jnp.concatenate([-w3[..., half:], w3[..., :half]],
                               axis=-1).reshape(H, n_heads * HD)

    wq_t = (wq.T / math.sqrt(HD)).astype(jnp.float32)   # (H, NH*HD), scale folded in
    wk_t = wk.T.astype(jnp.float32)                     # (H, NKV*HD)
    cos_full = jnp.tile(cos, (1, NH)).astype(jnp.float32)   # (S, NH*HD)
    sin_full = jnp.tile(sin, (1, NH)).astype(jnp.float32)
    return (ln1, wq_t, fold_rotate_half_cols(wq_t, NH),
            wk_t, fold_rotate_half_cols(wk_t, NKV),
            wv.T.astype(jnp.float32), wo.T.astype(jnp.float32),
            cos_full, sin_full,
            ln2, wg.T.astype(jnp.float32), wu.T.astype(jnp.float32),
            wd.T.astype(jnp.float32))


def decoder_layer_pallas(x, prepped):
    (ln1, wq_t, wqr_t, wk_t, wkr_t, wv_t, wo_t, cos_full, sin_full,
     ln2, wg_t, wu_t, wd_t) = prepped

    def const(shape):   # weight / table blocks: same block for every grid step (loaded once)
        return pl.BlockSpec(shape, lambda b: (0,) * len(shape))

    return pl.pallas_call(
        decoder_layer_kernel,
        out_shape=jax.ShapeDtypeStruct((B, S, H), jnp.float32),
        grid_spec=pltpu.PrefetchScalarGridSpec(
            num_scalar_prefetch=0,
            grid=(B,),
            in_specs=[
                pl.BlockSpec((1, S, H), lambda b: (b, 0, 0)),   # hidden_states
                const((1, H)),                                  # input_layernorm weight
                const((H, NH * HD)),                            # wq^T / sqrt(HD)
                const((H, NH * HD)),                            # rotate_half-folded wq^T
                const((H, NKV * HD)),                           # wk^T
                const((H, NKV * HD)),                           # rotate_half-folded wk^T
                const((H, NKV * HD)),                           # wv^T
                const((NH * HD, H)),                            # wo^T
                const((S, NH * HD)),                            # cos (tiled per head)
                const((S, NH * HD)),                            # sin (tiled per head)
                const((1, H)),                                  # post_attention_layernorm
                const((H, I)),                                  # gate_proj^T
                const((H, I)),                                  # up_proj^T
                const((I, H)),                                  # down_proj^T
            ],
            out_specs=pl.BlockSpec((1, S, H), lambda b: (b, 0, 0)),
        ),
        compiler_params=pltpu.CompilerParams(
            dimension_semantics=("parallel",)),   # B=2 -> both TCs on v7x; neutral on v5e/v6e
    )(x, ln1, wq_t, wqr_t, wk_t, wkr_t, wv_t, wo_t, cos_full, sin_full,
      ln2, wg_t, wu_t, wd_t)


# --------------------------- pure-JAX reference ------------------------------

def rmsnorm_ref(x, w):
    var = jnp.mean(x * x, axis=-1, keepdims=True)
    return w * (x * jax.lax.rsqrt(var + EPS))


def rotate_half_ref(x):
    x1 = x[..., :x.shape[-1] // 2]
    x2 = x[..., x.shape[-1] // 2:]
    return jnp.concatenate([-x2, x1], axis=-1)


def decoder_layer_ref(x, params, cos, sin, mask):
    ln1, wq, wk, wv, wo, ln2, wg, wu, wd = params
    residual = x
    xn = rmsnorm_ref(x, ln1)
    q = (xn @ wq.T).reshape(B, S, NH, HD).transpose(0, 2, 1, 3)
    k = (xn @ wk.T).reshape(B, S, NKV, HD).transpose(0, 2, 1, 3)
    v = (xn @ wv.T).reshape(B, S, NKV, HD).transpose(0, 2, 1, 3)
    c = cos[None, None]
    s = sin[None, None]
    q = q * c + rotate_half_ref(q) * s
    k = k * c + rotate_half_ref(k) * s
    k = jnp.repeat(k, N_REP, axis=1)
    v = jnp.repeat(v, N_REP, axis=1)
    scores = jnp.einsum("bhqd,bhkd->bhqk", q, k) / math.sqrt(HD) + mask
    p = jax.nn.softmax(scores, axis=-1)
    attn = jnp.einsum("bhqk,bhkd->bhqd", p, v)
    attn = attn.transpose(0, 2, 1, 3).reshape(B, S, H)
    hidden = residual + attn @ wo.T
    residual = hidden
    hn = rmsnorm_ref(hidden, ln2)
    g = hn @ wg.T
    u = hn @ wu.T
    mlp = (g * jax.nn.sigmoid(g) * u) @ wd.T
    return residual + mlp


# --------------------------- main --------------------------------------------

if __name__ == "__main__":
    key = jax.random.PRNGKey(0)
    ks = jax.random.split(key, 12)
    init = lambda k, shape: (0.02 * jax.random.normal(k, shape)).astype(jnp.float32)

    x = jax.random.normal(ks[0], (B, S, H), dtype=jnp.float32)

    ln1 = (1.0 + 0.01 * jax.random.normal(ks[1], (1, H))).astype(jnp.float32)
    ln2 = (1.0 + 0.01 * jax.random.normal(ks[2], (1, H))).astype(jnp.float32)
    wq = init(ks[3], (NH * HD, H))
    wk = init(ks[4], (NKV * HD, H))
    wv = init(ks[5], (NKV * HD, H))
    wo = init(ks[6], (H, NH * HD))
    wg = init(ks[7], (I, H))
    wu = init(ks[8], (I, H))
    wd = init(ks[9], (H, I))
    raw_params = (ln1, wq, wk, wv, wo, ln2, wg, wu, wd)

    # Rotary embedding tables (position_ids = arange(S))
    inv_freq = 1.0 / (ROPE_THETA ** (jnp.arange(0, HD, 2, dtype=jnp.float32) / HD))
    t = jnp.arange(S, dtype=jnp.float32)
    freqs = jnp.einsum("i,j->ij", t, inv_freq)
    emb = jnp.concatenate([freqs, freqs], axis=-1)
    cos = jnp.cos(emb).astype(jnp.float32)   # (S, HD)
    sin = jnp.sin(emb).astype(jnp.float32)   # (S, HD)

    # ---- Pallas kernel (mask is generated in-kernel) ----
    prepped = prep_params(ln1, wq, wk, wv, wo, ln2, wg, wu, wd, cos, sin)
    out = decoder_layer_pallas(x, prepped)
    out = jax.block_until_ready(out)

    # ---- reference (explicit causal mask, matching the module's usual call) ----
    causal = jnp.tril(jnp.ones((S, S), dtype=bool))
    mask = jnp.where(causal, 0.0, -1e9).astype(jnp.float32)
    mask = jnp.broadcast_to(mask[None, None], (B, 1, S, S))
    ref = decoder_layer_ref(x, raw_params, cos, sin, mask)

    np.testing.assert_allclose(np.asarray(out), np.asarray(ref), rtol=1e-4, atol=1e-4)
    print("KERNEL_OK")
</pallas_src>

<mosaic_0001>
module attributes {stable_mosaic.version = 11 : i64} {
  func.func @decoder_layer_kernel(%arg0: i32, %arg1: memref<1x8x128xf32, #tpu.memory_space<vmem>>, %arg2: memref<1x128xf32, #tpu.memory_space<vmem>>, %arg3: memref<128x128xf32, #tpu.memory_space<vmem>>, %arg4: memref<128x128xf32, #tpu.memory_space<vmem>>, %arg5: memref<128x64xf32, #tpu.memory_space<vmem>>, %arg6: memref<128x64xf32, #tpu.memory_space<vmem>>, %arg7: memref<128x64xf32, #tpu.memory_space<vmem>>, %arg8: memref<128x128xf32, #tpu.memory_space<vmem>>, %arg9: memref<8x128xf32, #tpu.memory_space<vmem>>, %arg10: memref<8x128xf32, #tpu.memory_space<vmem>>, %arg11: memref<1x128xf32, #tpu.memory_space<vmem>>, %arg12: memref<128x256xf32, #tpu.memory_space<vmem>>, %arg13: memref<128x256xf32, #tpu.memory_space<vmem>>, %arg14: memref<256x128xf32, #tpu.memory_space<vmem>>, %arg15: memref<1x8x128xf32, #tpu.memory_space<vmem>>) attributes {dimension_semantics = [#tpu.dimension_semantics<parallel>], iteration_bounds = array<i64: 2>, scalar_prefetch = 0 : i64, scratch_operands = 0 : i64, tpu.core_type = #tpu.core_type<tc>, window_params = [{transform_indices = @transform_0, window_bounds = array<i64: 1, 8, 128>}, {pipeline_mode = #tpu.pipeline_mode<synchronous>, transform_indices = @transform_1, window_bounds = array<i64: 1, 128>}, {pipeline_mode = #tpu.pipeline_mode<synchronous>, transform_indices = @transform_2, window_bounds = array<i64: 128, 128>}, {pipeline_mode = #tpu.pipeline_mode<synchronous>, transform_indices = @transform_3, window_bounds = array<i64: 128, 128>}, {pipeline_mode = #tpu.pipeline_mode<synchronous>, transform_indices = @transform_4, window_bounds = array<i64: 128, 64>}, {pipeline_mode = #tpu.pipeline_mode<synchronous>, transform_indices = @transform_5, window_bounds = array<i64: 128, 64>}, {pipeline_mode = #tpu.pipeline_mode<synchronous>, transform_indices = @transform_6, window_bounds = array<i64: 128, 64>}, {pipeline_mode = #tpu.pipeline_mode<synchronous>, transform_indices = @transform_7, window_bounds = array<i64: 128, 128>}, {pipeline_mode = #tpu.pipeline_mode<synchronous>, transform_indices = @transform_8, window_bounds = array<i64: 8, 128>}, {pipeline_mode = #tpu.pipeline_mode<synchronous>, transform_indices = @transform_9, window_bounds = array<i64: 8, 128>}, {pipeline_mode = #tpu.pipeline_mode<synchronous>, transform_indices = @transform_10, window_bounds = array<i64: 1, 128>}, {pipeline_mode = #tpu.pipeline_mode<synchronous>, transform_indices = @transform_11, window_bounds = array<i64: 128, 256>}, {pipeline_mode = #tpu.pipeline_mode<synchronous>, transform_indices = @transform_12, window_bounds = array<i64: 128, 256>}, {pipeline_mode = #tpu.pipeline_mode<synchronous>, transform_indices = @transform_13, window_bounds = array<i64: 256, 128>}, {transform_indices = @transform_14, window_bounds = array<i64: 1, 8, 128>}]} {
    %c0 = arith.constant 0 : index
    %c0_0 = arith.constant 0 : index
    %c0_1 = arith.constant 0 : index
    %0 = vector.load %arg1[%c0, %c0_0, %c0_1] : memref<1x8x128xf32, #tpu.memory_space<vmem>>, vector<1x8x128xf32>
    %1 = vector.shape_cast %0 : vector<1x8x128xf32> to vector<8x128xf32>
    %2 = arith.mulf %1, %1 : vector<8x128xf32>
    %cst = arith.constant dense<0.000000e+00> : vector<8xf32>
    %3 = vector.multi_reduction <add>, %2, %cst [1] : vector<8x128xf32> to vector<8xf32>
    %4 = vector.shape_cast %3 : vector<8xf32> to vector<8x1xf32>
    %cst_2 = arith.constant 1.280000e+02 : f32
    %5 = vector.broadcast %cst_2 : f32 to vector<8x1xf32>
    %6 = arith.divf %4, %5 : vector<8x1xf32>
    %cst_3 = arith.constant 9.99999997E-7 : f32
    %7 = vector.broadcast %cst_3 : f32 to vector<8x1xf32>
    %8 = arith.addf %6, %7 : vector<8x1xf32>
    %9 = math.rsqrt %8 : vector<8x1xf32>
    %10 = vector.broadcast %9 : vector<8x1xf32> to vector<8x128xf32>
    %11 = arith.mulf %1, %10 : vector<8x128xf32>
    %c0_4 = arith.constant 0 : index
    %c0_5 = arith.constant 0 : index
    %12 = vector.load %arg2[%c0_4, %c0_5] : memref<1x128xf32, #tpu.memory_space<vmem>>, vector<1x128xf32>
    %13 = vector.shape_cast %12 : vector<1x128xf32> to vector<128xf32>
    %14 = vector.shape_cast %13 : vector<128xf32> to vector<1x128xf32>
    %15 = vector.broadcast %14 : vector<1x128xf32> to vector<8x128xf32>
    %16 = arith.mulf %11, %15 : vector<8x128xf32>
    %c0_6 = arith.constant 0 : index
    %c0_7 = arith.constant 0 : index
    %17 = vector.load %arg3[%c0_6, %c0_7] : memref<128x128xf32, #tpu.memory_space<vmem>>, vector<128x128xf32>
    %cst_8 = arith.constant dense<0.000000e+00> : vector<8x128xf32>
    %18 = tpu.matmul %16, %17, %cst_8 {dimension_numbers = #tpu.dot_dimension_numbers<[1], [0], [0], [1], [0, 0, 1, 1], [], []>} : vector<8x128xf32>, vector<128x128xf32>, vector<8x128xf32> -> vector<8x128xf32>
    %c0_9 = arith.constant 0 : index
    %c0_10 = arith.constant 0 : index
    %19 = vector.load %arg4[%c0_9, %c0_10] : memref<128x128xf32, #tpu.memory_space<vmem>>, vector<128x128xf32>
    %cst_11 = arith.constant dense<0.000000e+00> : vector<8x128xf32>
    %20 = tpu.matmul %16, %19, %cst_11 {dimension_numbers = #tpu.dot_dimension_numbers<[1], [0], [0], [1], [0, 0, 1, 1], [], []>} : vector<8x128xf32>, vector<128x128xf32>, vector<8x128xf32> -> vector<8x128xf32>
    %c0_12 = arith.constant 0 : index
    %c0_13 = arith.constant 0 : index
    %21 = vector.load %arg5[%c0_12, %c0_13] : memref<128x64xf32, #tpu.memory_space<vmem>>, vector<128x64xf32>
    %cst_14 = arith.constant dense<0.000000e+00> : vector<8x64xf32>
    %22 = tpu.matmul %16, %21, %cst_14 {dimension_numbers = #tpu.dot_dimension_numbers<[1], [0], [0], [1], [0, 0, 1, 1], [], []>} : vector<8x128xf32>, vector<128x64xf32>, vector<8x64xf32> -> vector<8x64xf32>
    %c0_15 = arith.constant 0 : index
    %c0_16 = arith.constant 0 : index
    %23 = vector.load %arg6[%c0_15, %c0_16] : memref<128x64xf32, #tpu.memory_space<vmem>>, vector<128x64xf32>
    %cst_17 = arith.constant dense<0.000000e+00> : vector<8x64xf32>
    %24 = tpu.matmul %16, %23, %cst_17 {dimension_numbers = #tpu.dot_dimension_numbers<[1], [0], [0], [1], [0, 0, 1, 1], [], []>} : vector<8x128xf32>, vector<128x64xf32>, vector<8x64xf32> -> vector<8x64xf32>
    %c0_18 = arith.constant 0 : index
    %c0_19 = arith.constant 0 : index
    %25 = vector.load %arg7[%c0_18, %c0_19] : memref<128x64xf32, #tpu.memory_space<vmem>>, vector<128x64xf32>
    %cst_20 = arith.constant dense<0.000000e+00> : vector<8x64xf32>
    %26 = tpu.matmul %16, %25, %cst_20 {dimension_numbers = #tpu.dot_dimension_numbers<[1], [0], [0], [1], [0, 0, 1, 1], [], []>} : vector<8x128xf32>, vector<128x64xf32>, vector<8x64xf32> -> vector<8x64xf32>
    %c0_21 = arith.constant 0 : index
    %c0_22 = arith.constant 0 : index
    %27 = vector.load %arg9[%c0_21, %c0_22] : memref<8x128xf32, #tpu.memory_space<vmem>>, vector<8x128xf32>
    %c0_23 = arith.constant 0 : index
    %c0_24 = arith.constant 0 : index
    %28 = vector.load %arg10[%c0_23, %c0_24] : memref<8x128xf32, #tpu.memory_space<vmem>>, vector<8x128xf32>
    %29 = arith.mulf %18, %27 : vector<8x128xf32>
    %30 = arith.mulf %20, %28 : vector<8x128xf32>
    %31 = arith.addf %29, %30 : vector<8x128xf32>
    %32 = vector.extract_strided_slice %27 {offsets = [0, 0], sizes = [8, 64], strides = [1, 1]} : vector<8x128xf32> to vector<8x64xf32>
    %33 = arith.mulf %22, %32 : vector<8x64xf32>
    %34 = vector.extract_strided_slice %28 {offsets = [0, 0], sizes = [8, 64], strides = [1, 1]} : vector<8x128xf32> to vector<8x64xf32>
    %35 = arith.mulf %24, %34 : vector<8x64xf32>
    %36 = arith.addf %33, %35 : vector<8x64xf32>
    %37 = tpu.iota {dimensions = array<i32: 0>} : vector<16x8xi32>
    %c8_i32 = arith.constant 8 : i32
    %38 = vector.broadcast %c8_i32 : i32 to vector<16x8xi32>
    %39 = arith.remsi %37, %38 : vector<16x8xi32>
    %40 = tpu.iota {dimensions = array<i32: 1>} : vector<16x8xi32>
    %41 = arith.cmpi sle, %40, %39 : vector<16x8xi32>
    %cst_25 = arith.constant 0.000000e+00 : f32
    %cst_26 = arith.constant -1.000000e+09 : f32
    %42 = vector.broadcast %cst_25 : f32 to vector<16x8xf32>
    %43 = vector.broadcast %cst_26 : f32 to vector<16x8xf32>
    %44 = arith.select %41, %42, %43 : vector<16x8xi1>, vector<16x8xf32>
    %45 = vector.extract_strided_slice %31 {offsets = [0, 0], sizes = [8, 32], strides = [1, 1]} : vector<8x128xf32> to vector<8x32xf32>
    %46 = vector.extract_strided_slice %31 {offsets = [0, 32], sizes = [8, 32], strides = [1, 1]} : vector<8x128xf32> to vector<8x32xf32>
    %47 = tpu.concatenate %45, %46 in 0 : vector<8x32xf32>, vector<8x32xf32> -> vector<16x32xf32>
    %48 = vector.extract_strided_slice %36 {offsets = [0, 0], sizes = [8, 32], strides = [1, 1]} : vector<8x64xf32> to vector<8x32xf32>
    %49 = vector.extract_strided_slice %26 {offsets = [0, 0], sizes = [8, 32], strides = [1, 1]} : vector<8x64xf32> to vector<8x32xf32>
    %cst_27 = arith.constant dense<0.000000e+00> : vector<16x8xf32>
    %50 = tpu.matmul %47, %48, %cst_27 {dimension_numbers = #tpu.dot_dimension_numbers<[1], [1], [0], [0], [0, 0, 1, 0], [], []>} : vector<16x32xf32>, vector<8x32xf32>, vector<16x8xf32> -> vector<16x8xf32>
    %51 = arith.addf %50, %44 : vector<16x8xf32>
    %cst_28 = arith.constant dense<0xFF800000> : vector<16xf32>
    %52 = vector.multi_reduction <maximumf>, %51, %cst_28 [1] : vector<16x8xf32> to vector<16xf32>
    %53 = vector.shape_cast %52 : vector<16xf32> to vector<16x1xf32>
    %54 = vector.broadcast %53 : vector<16x1xf32> to vector<16x8xf32>
    %55 = arith.subf %51, %54 : vector<16x8xf32>
    %56 = math.exp %55 : vector<16x8xf32>
    %cst_29 = arith.constant dense<0.000000e+00> : vector<16xf32>
    %57 = vector.multi_reduction <add>, %56, %cst_29 [1] : vector<16x8xf32> to vector<16xf32>
    %58 = vector.shape_cast %57 : vector<16xf32> to vector<16x1xf32>
    %59 = tpu.reciprocal %58 : vector<16x1xf32> -> vector<16x1xf32>
    %60 = vector.broadcast %59 : vector<16x1xf32> to vector<16x8xf32>
    %61 = arith.mulf %56, %60 : vector<16x8xf32>
    %cst_30 = arith.constant dense<0.000000e+00> : vector<16x32xf32>
    %62 = tpu.matmul %61, %49, %cst_30 {dimension_numbers = #tpu.dot_dimension_numbers<[1], [0], [0], [1], [0, 0, 1, 1], [], []>} : vector<16x8xf32>, vector<8x32xf32>, vector<16x32xf32> -> vector<16x32xf32>
    %63 = vector.extract_strided_slice %31 {offsets = [0, 64], sizes = [8, 32], strides = [1, 1]} : vector<8x128xf32> to vector<8x32xf32>
    %64 = vector.extract_strided_slice %31 {offsets = [0, 96], sizes = [8, 32], strides = [1, 1]} : vector<8x128xf32> to vector<8x32xf32>
    %65 = tpu.concatenate %63, %64 in 0 : vector<8x32xf32>, vector<8x32xf32> -> vector<16x32xf32>
    %66 = vector.extract_strided_slice %36 {offsets = [0, 32], sizes = [8, 32], strides = [1, 1]} : vector<8x64xf32> to vector<8x32xf32>
    %67 = vector.extract_strided_slice %26 {offsets = [0, 32], sizes = [8, 32], strides = [1, 1]} : vector<8x64xf32> to vector<8x32xf32>
    %cst_31 = arith.constant dense<0.000000e+00> : vector<16x8xf32>
    %68 = tpu.matmul %65, %66, %cst_31 {dimension_numbers = #tpu.dot_dimension_numbers<[1], [1], [0], [0], [0, 0, 1, 0], [], []>} : vector<16x32xf32>, vector<8x32xf32>, vector<16x8xf32> -> vector<16x8xf32>
    %69 = arith.addf %68, %44 : vector<16x8xf32>
    %cst_32 = arith.constant dense<0xFF800000> : vector<16xf32>
    %70 = vector.multi_reduction <maximumf>, %69, %cst_32 [1] : vector<16x8xf32> to vector<16xf32>
    %71 = vector.shape_cast %70 : vector<16xf32> to vector<16x1xf32>
    %72 = vector.broadcast %71 : vector<16x1xf32> to vector<16x8xf32>
    %73 = arith.subf %69, %72 : vector<16x8xf32>
    %74 = math.exp %73 : vector<16x8xf32>
    %cst_33 = arith.constant dense<0.000000e+00> : vector<16xf32>
    %75 = vector.multi_reduction <add>, %74, %cst_33 [1] : vector<16x8xf32> to vector<16xf32>
    %76 = vector.shape_cast %75 : vector<16xf32> to vector<16x1xf32>
    %77 = tpu.reciprocal %76 : vector<16x1xf32> -> vector<16x1xf32>
    %78 = vector.broadcast %77 : vector<16x1xf32> to vector<16x8xf32>
    %79 = arith.mulf %74, %78 : vector<16x8xf32>
    %cst_34 = arith.constant dense<0.000000e+00> : vector<16x32xf32>
    %80 = tpu.matmul %79, %67, %cst_34 {dimension_numbers = #tpu.dot_dimension_numbers<[1], [0], [0], [1], [0, 0, 1, 1], [], []>} : vector<16x8xf32>, vector<8x32xf32>, vector<16x32xf32> -> vector<16x32xf32>
    %81 = vector.extract_strided_slice %62 {offsets = [0, 0], sizes = [8, 32], strides = [1, 1]} : vector<16x32xf32> to vector<8x32xf32>
    %82 = vector.extract_strided_slice %62 {offsets = [8, 0], sizes = [8, 32], strides = [1, 1]} : vector<16x32xf32> to vector<8x32xf32>
    %83 = vector.extract_strided_slice %80 {offsets = [0, 0], sizes = [8, 32], strides = [1, 1]} : vector<16x32xf32> to vector<8x32xf32>
    %84 = vector.extract_strided_slice %80 {offsets = [8, 0], sizes = [8, 32], strides = [1, 1]} : vector<16x32xf32> to vector<8x32xf32>
    %85 = tpu.concatenate %81, %82, %83, %84 in 1 : vector<8x32xf32>, vector<8x32xf32>, vector<8x32xf32>, vector<8x32xf32> -> vector<8x128xf32>
    %c0_35 = arith.constant 0 : index
    %c0_36 = arith.constant 0 : index
    %86 = vector.load %arg8[%c0_35, %c0_36] : memref<128x128xf32, #tpu.memory_space<vmem>>, vector<128x128xf32>
    %cst_37 = arith.constant dense<0.000000e+00> : vector<8x128xf32>
    %87 = tpu.matmul %85, %86, %cst_37 {dimension_numbers = #tpu.dot_dimension_numbers<[1], [0], [0], [1], [0, 0, 1, 1], [], []>} : vector<8x128xf32>, vector<128x128xf32>, vector<8x128xf32> -> vector<8x128xf32>
    %88 = arith.addf %1, %87 : vector<8x128xf32>
    %89 = arith.mulf %88, %88 : vector<8x128xf32>
    %cst_38 = arith.constant dense<0.000000e+00> : vector<8xf32>
    %90 = vector.multi_reduction <add>, %89, %cst_38 [1] : vector<8x128xf32> to vector<8xf32>
    %91 = vector.shape_cast %90 : vector<8xf32> to vector<8x1xf32>
    %cst_39 = arith.constant 1.280000e+02 : f32
    %92 = vector.broadcast %cst_39 : f32 to vector<8x1xf32>
    %93 = arith.divf %91, %92 : vector<8x1xf32>
    %cst_40 = arith.constant 9.99999997E-7 : f32
    %94 = vector.broadcast %cst_40 : f32 to vector<8x1xf32>
    %95 = arith.addf %93, %94 : vector<8x1xf32>
    %96 = math.rsqrt %95 : vector<8x1xf32>
    %97 = vector.broadcast %96 : vector<8x1xf32> to vector<8x128xf32>
    %98 = arith.mulf %88, %97 : vector<8x128xf32>
    %c0_41 = arith.constant 0 : index
    %c0_42 = arith.constant 0 : index
    %99 = vector.load %arg11[%c0_41, %c0_42] : memref<1x128xf32, #tpu.memory_space<vmem>>, vector<1x128xf32>
    %100 = vector.shape_cast %99 : vector<1x128xf32> to vector<128xf32>
    %101 = vector.shape_cast %100 : vector<128xf32> to vector<1x128xf32>
    %102 = vector.broadcast %101 : vector<1x128xf32> to vector<8x128xf32>
    %103 = arith.mulf %98, %102 : vector<8x128xf32>
    %c0_43 = arith.constant 0 : index
    %c0_44 = arith.constant 0 : index
    %104 = vector.load %arg12[%c0_43, %c0_44] : memref<128x256xf32, #tpu.memory_space<vmem>>, vector<128x256xf32>
    %cst_45 = arith.constant dense<0.000000e+00> : vector<8x256xf32>
    %105 = tpu.matmul %103, %104, %cst_45 {dimension_numbers = #tpu.dot_dimension_numbers<[1], [0], [0], [1], [0, 0, 1, 1], [], []>} : vector<8x128xf32>, vector<128x256xf32>, vector<8x256xf32> -> vector<8x256xf32>
    %c0_46 = arith.constant 0 : index
    %c0_47 = arith.constant 0 : index
    %106 = vector.load %arg13[%c0_46, %c0_47] : memref<128x256xf32, #tpu.memory_space<vmem>>, vector<128x256xf32>
    %cst_48 = arith.constant dense<0.000000e+00> : vector<8x256xf32>
    %107 = tpu.matmul %103, %106, %cst_48 {dimension_numbers = #tpu.dot_dimension_numbers<[1], [0], [0], [1], [0, 0, 1, 1], [], []>} : vector<8x128xf32>, vector<128x256xf32>, vector<8x256xf32> -> vector<8x256xf32>
    %108 = arith.negf %105 : vector<8x256xf32>
    %109 = math.exp %108 : vector<8x256xf32>
    %cst_49 = arith.constant 1.000000e+00 : f32
    %110 = vector.broadcast %cst_49 : f32 to vector<8x256xf32>
    %111 = arith.addf %110, %109 : vector<8x256xf32>
    %112 = arith.divf %110, %111 : vector<8x256xf32>
    %113 = arith.mulf %105, %112 : vector<8x256xf32>
    %114 = arith.mulf %113, %107 : vector<8x256xf32>
    %c0_50 = arith.constant 0 : index
    %c0_51 = arith.constant 0 : index
    %115 = vector.load %arg14[%c0_50, %c0_51] : memref<256x128xf32, #tpu.memory_space<vmem>>, vector<256x128xf32>
    %cst_52 = arith.constant dense<0.000000e+00> : vector<8x128xf32>
    %116 = tpu.matmul %114, %115, %cst_52 {dimension_numbers = #tpu.dot_dimension_numbers<[1], [0], [0], [1], [0, 0, 1, 1], [], []>} : vector<8x256xf32>, vector<256x128xf32>, vector<8x128xf32> -> vector<8x128xf32>
    %117 = arith.addf %88, %116 : vector<8x128xf32>
    %c0_53 = arith.constant 0 : index
    %c0_54 = arith.constant 0 : index
    %c0_55 = arith.constant 0 : index
    %118 = vector.load %arg15[%c0_53, %c0_54, %c0_55] : memref<1x8x128xf32, #tpu.memory_space<vmem>>, vector<1x8x128xf32>
    %119 = vector.shape_cast %118 : vector<1x8x128xf32> to vector<8x128xf32>
    %120 = vector.shape_cast %117 : vector<8x128xf32> to vector<1x8x128xf32>
    tpu.vector_store %arg15[%c0_53, %c0_54, %c0_55], %120 {strides = array<i32>} : memref<1x8x128xf32, #tpu.memory_space<vmem>>, vector<1x8x128xf32>,
    return
  }
  func.func @transform_0(%arg0: i32) -> (i32, i32, i32) {
    %c0_i32 = arith.constant 0 : i32
    %c0_i32_0 = arith.constant 0 : i32
    %c0_i32_1 = arith.constant 0 : i32
    return %arg0, %c0_i32, %c0_i32_0 : i32, i32, i32
  }
  func.func @transform_1(%arg0: i32) -> (i32, i32) {
    %c0_i32 = arith.constant 0 : i32
    %c0_i32_0 = arith.constant 0 : i32
    %c0_i32_1 = arith.constant 0 : i32
    return %c0_i32, %c0_i32_0 : i32, i32
  }
  func.func @transform_2(%arg0: i32) -> (i32, i32) {
    %c0_i32 = arith.constant 0 : i32
    %c0_i32_0 = arith.constant 0 : i32
    %c0_i32_1 = arith.constant 0 : i32
    return %c0_i32, %c0_i32_0 : i32, i32
  }
  func.func @transform_3(%arg0: i32) -> (i32, i32) {
    %c0_i32 = arith.constant 0 : i32
    %c0_i32_0 = arith.constant 0 : i32
    %c0_i32_1 = arith.constant 0 : i32
    return %c0_i32, %c0_i32_0 : i32, i32
  }
  func.func @transform_4(%arg0: i32) -> (i32, i32) {
    %c0_i32 = arith.constant 0 : i32
    %c0_i32_0 = arith.constant 0 : i32
    %c0_i32_1 = arith.constant 0 : i32
    return %c0_i32, %c0_i32_0 : i32, i32
  }
  func.func @transform_5(%arg0: i32) -> (i32, i32) {
    %c0_i32 = arith.constant 0 : i32
    %c0_i32_0 = arith.constant 0 : i32
    %c0_i32_1 = arith.constant 0 : i32
    return %c0_i32, %c0_i32_0 : i32, i32
  }
  func.func @transform_6(%arg0: i32) -> (i32, i32) {
    %c0_i32 = arith.constant 0 : i32
    %c0_i32_0 = arith.constant 0 : i32
    %c0_i32_1 = arith.constant 0 : i32
    return %c0_i32, %c0_i32_0 : i32, i32
  }
  func.func @transform_7(%arg0: i32) -> (i32, i32) {
    %c0_i32 = arith.constant 0 : i32
    %c0_i32_0 = arith.constant 0 : i32
    %c0_i32_1 = arith.constant 0 : i32
    return %c0_i32, %c0_i32_0 : i32, i32
  }
  func.func @transform_8(%arg0: i32) -> (i32, i32) {
    %c0_i32 = arith.constant 0 : i32
    %c0_i32_0 = arith.constant 0 : i32
    %c0_i32_1 = arith.constant 0 : i32
    return %c0_i32, %c0_i32_0 : i32, i32
  }
  func.func @transform_9(%arg0: i32) -> (i32, i32) {
    %c0_i32 = arith.constant 0 : i32
    %c0_i32_0 = arith.constant 0 : i32
    %c0_i32_1 = arith.constant 0 : i32
    return %c0_i32, %c0_i32_0 : i32, i32
  }
  func.func @transform_10(%arg0: i32) -> (i32, i32) {
    %c0_i32 = arith.constant 0 : i32
    %c0_i32_0 = arith.constant 0 : i32
    %c0_i32_1 = arith.constant 0 : i32
    return %c0_i32, %c0_i32_0 : i32, i32
  }
  func.func @transform_11(%arg0: i32) -> (i32, i32) {
    %c0_i32 = arith.constant 0 : i32
    %c0_i32_0 = arith.constant 0 : i32
    %c0_i32_1 = arith.constant 0 : i32
    return %c0_i32, %c0_i32_0 : i32, i32
  }
  func.func @transform_12(%arg0: i32) -> (i32, i32) {
    %c0_i32 = arith.constant 0 : i32
    %c0_i32_0 = arith.constant 0 : i32
    %c0_i32_1 = arith.constant 0 : i32
    return %c0_i32, %c0_i32_0 : i32, i32
  }
  func.func @transform_13(%arg0: i32) -> (i32, i32) {
    %c0_i32 = arith.constant 0 : i32
    %c0_i32_0 = arith.constant 0 : i32
    %c0_i32_1 = arith.constant 0 : i32
    return %c0_i32, %c0_i32_0 : i32, i32
  }
  func.func @transform_14(%arg0: i32) -> (i32, i32, i32) {
    %c0_i32 = arith.constant 0 : i32
    %c0_i32_0 = arith.constant 0 : i32
    %c0_i32_1 = arith.constant 0 : i32
    return %arg0, %c0_i32, %c0_i32_0 : i32, i32, i32
  }
}

</mosaic_0001>

<bundles_post_ra>
// kernel: tpu_custom_call.1
= control target key start
LH: loop header
LB: loop body
LE: loop exit
PB: predicated region body
PF: predicated region fallthrough
CT: control target
= control target key end

     0   :  { %s3816_s0 = inlined_call_operand.hbm [shape: f32[2,8,128], index: 0, kind: input, shape index: {}]   ;;  %s3817_s1 = inlined_call_operand.vmem [shape: f32[1,128], index: 1, kind: input, shape index: {}]   ;;  %s3818_s2 = inlined_call_operand.hbm [shape: f32[128,128], index: 2, kind: input, shape index: {}]   ;;  %s3819_s3 = inlined_call_operand.hbm [shape: f32[128,128], index: 3, kind: input, shape index: {}]   ;;  %s3820_s4 = inlined_call_operand.vmem [shape: f32[128,64], index: 4, kind: input, shape index: {}]   ;;  %s3821_s5 = inlined_call_operand.vmem [shape: f32[128,64], index: 5, kind: input, shape index: {}]   ;;  %s3822_s6 = inlined_call_operand.vmem [shape: f32[128,64], index: 6, kind: input, shape index: {}]   ;;  %s3823_s7 = inlined_call_operand.hbm [shape: f32[128,128], index: 7, kind: input, shape index: {}]   ;;  %s3824_s8 = inlined_call_operand.vmem [shape: f32[8,128], index: 8, kind: input, shape index: {}]   ;;  %s3825_s9 = inlined_call_operand.vmem [shape: f32[8,128], index: 9, kind: input, shape index: {}]   ;;  %s3826_s10 = inlined_call_operand.vmem [shape: f32[1,128], index: 10, kind: input, shape index: {}]   ;;  %s3827_s11 = inlined_call_operand.vmem [shape: f32[128,256], index: 11, kind: input, shape index: {}]   ;;  %s3828_s12 = inlined_call_operand.vmem [shape: f32[128,256], index: 12, kind: input, shape index: {}]   ;;  %s3829_s13 = inlined_call_operand.hbm [shape: f32[256,128], index: 13, kind: input, shape index: {}]   ;;  %s3830_s14 = inlined_call_operand.hbm [shape: f32[2,8,128], index: 14, kind: output, shape index: {}]  }
   0x1   :  { %3838 = sst [smem:[#allocation16_spill]] %s3818_s2 }
   0x2   :  { %3839 = sst [smem:[#allocation17_spill]] %s3824_s8 }
   0x3   :  { %3840 = sst [smem:[#allocation18_spill]] %s3825_s9 }
   0x4   :  { %3841 = sst [smem:[#allocation19_spill]] %s3826_s10 }
   0x5   :  { %3842 = sst [smem:[#allocation20_spill]] %s3827_s11 }
   0x6   :  { %3843 = sst [smem:[#allocation21_spill]] %s3828_s12 }
   0x7   :  { %3844 = sst [smem:[#allocation22_spill]] %s3830_s14 }
   0x8   :  { %19 = vsyncpa [#allocation3], 0 }
   0x9   :  { %21 = vsyncpa [#allocation3 + $0x1], 0 }
   0xa   :  { %22 = vsyncpa [#allocation6], 0 }
   0xb   :  { %23 = vsyncpa [#allocation9], 0 }
   0xc   :  { %24 = vsyncpa [#allocation4], 0 }
   0xd   :  { %26 = vsyncpa [#allocation4 + $0x1], 0  ;;  %s3055_s29 = smov 0   ;;  %s3057_s30 = smov 0  }
   0xe   :  { %s3059_s15 = smov 0   ;;  %s3061_s16 = smov 0  }
   0xf LB: > { %s2965_s17 = smov [#allocation5]   ;;  %s3076_s19 = sadd.s32 4294967295, %s2963_s16   ;;  %s2963_s16 = sphi %s3061_s16, %s3873_s16   ;;  %s2959_s15 = sphi %s3059_s15, %s3872_s15   ;;  %s2955_s30 = sphi %s3057_s30, %s3871_s30   ;;  %s2951_s29 = sphi %s3055_s29, %s3870_s29  }
  0x10   : > { %s377_s18 = sshll.u32 %s2965_s17, 4  ;;  %p1971_p0 = scmp.ge.s32.totalorder %s2963_s16, 1  ;;  %s3081_s18 = int_to_ptr.vmem [resolvable:$true] %s377_s18 }
  0x11   : > { %p3834_p1 = scmp.eq.s32.totalorder %s3076_s19, 0  ;;  %p362_p2 = scmp.lt.s32.totalorder %s2963_s16, 3 }
  0x12   : > { %s2966_s21 = smov [#allocation8]   ;;  %s2967_s24 = smov [#allocation7]  }
  0x13   : > { %p3083_p3 = pnand %p1971_p0, %p362_p2  ;;  %s412_s22 = sshll.u32 %s2966_s21, 4  ;;  %s3096_s22 = int_to_ptr.vmem [resolvable:$true] %s412_s22 }
  0x14   : > { %s390_s25 = sshll.u32 %s2967_s24, 4  ;;  %s3847_s2 = sld [smem:[#allocation16_spill]]  ;;  %s3098_s25 = int_to_ptr.vmem [resolvable:$true] %s390_s25 }
  0x15   : > { %s3845_s20 = scalar_select %p3083_p3, 1, 0 }
  0x16   : > { %p2643_p5 = pneg %p3083_p3 }
  0x18   : > { %p3092_p6 = pnand %p2643_p5, %p3834_p1 }
  0x1a   : > { %s2747_s28 = scalar_lea.hbm %s3847_s2, 2048  ;;  %p3108_p8 = pneg %p3092_p6 }
  0x1b   : > { %p2748_p7 = scmp.ne.s32.totalorder %s3847_s2, %s2747_s28  ;;  %p2754_p11 = scmp.lt.u32.totalorder %s2747_s28, %s3847_s2 }
  0x1d   : > { %p2750_p9 = pnand %p3108_p8, %p2748_p7 }
  0x1f   : > { %p2751_p10 = pneg %p2750_p9 }
  0x21   : > { %p2756_p12 = pnand %p2754_p11, %p2751_p10 }
  0x23   : > { %2759 = shalt.err (!%p2756_p12)
}
  0x24   : > { %s2760_s14 = scalar_lea.vmem %s3081_s18, 2048  ;;  %p2768_p5 = scmp.lt.s32.totalorder %s3081_s18, %s3081_s18 }
  0x25   : > { %p2761_p13 = scmp.ne.s32.totalorder %s3081_s18, %s2760_s14  ;;  %p2769_p4 = scmp.lt.s32.totalorder %s2760_s14, %s2760_s14 }
  0x27   : > { %p2763_p0 = pnand %p2761_p13, %p3108_p8  ;;  %p2770_p7 = por %p2769_p4, %p2768_p5 }
  0x29   : > { %p2764_p2 = pneg %p2763_p0 }
  0x2b   : > { %p2771_p9 = pnand %p2770_p7, %p2764_p2 }
  0x2d   : > { %2774 = shalt.err (!%p2771_p9)
}
  0x2e   : > { %s2968_s26 = smov 128   ;;  %s2969_s10 = smov 8  }
  0x2f   : > { %2646 = dma.hbm_to_vmem [thread:$0]  (!%p3092_p6), %s3847_s2, 2048, %s3081_s18, [#allocation6], %s2968_s26, %s2968_s26, %s2969_s10  }
  0x30   : > { %s2775_s14 = scalar_lea.hbm %s3823_s7, 2048 }
  0x31   : > { %p2776_p4 = scmp.ne.s32.totalorder %s3823_s7, %s2775_s14  ;;  %p2782_p12 = scmp.lt.u32.totalorder %s2775_s14, %s3823_s7 }
  0x33   : > { %p2778_p10 = pnand %p2776_p4, %p3108_p8 }
  0x35   : > { %p2779_p11 = pneg %p2778_p10 }
  0x37   : > { %p2784_p13 = pnand %p2782_p12, %p2779_p11 }
  0x39   : > { %2787 = shalt.err (!%p2784_p13)
}
  0x3a   : > { %s2788_s18 = scalar_lea.vmem %s3096_s22, 2048  ;;  %p2796_p7 = scmp.lt.s32.totalorder %s3096_s22, %s3096_s22 }
  0x3b   : > { %p2789_p0 = scmp.ne.s32.totalorder %s3096_s22, %s2788_s18  ;;  %p2797_p9 = scmp.lt.s32.totalorder %s2788_s18, %s2788_s18 }
  0x3d   : > { %p2791_p2 = pnand %p2789_p0, %p3108_p8  ;;  %p2798_p4 = por %p2797_p9, %p2796_p7 }
  0x3f   : > { %p2792_p5 = pneg %p2791_p2 }
  0x41   : > { %p2799_p10 = pnand %p2798_p4, %p2792_p5 }
  0x43   : > { %2802 = shalt.err (!%p2799_p10)
}
  0x44   : > { %2652 = dma.hbm_to_vmem [thread:$0]  (!%p3092_p6), %s3823_s7, 2048, %s3096_s22, [#allocation9], %s2968_s26, %s2968_s26, %s2969_s10  }
  0x45   : > { %s2803_s27 = scalar_lea.hbm %s3819_s3, 2048 }
  0x46   : > { %p2804_p11 = scmp.ne.s32.totalorder %s3819_s3, %s2803_s27  ;;  %p2810_p0 = scmp.lt.u32.totalorder %s2803_s27, %s3819_s3 }
  0x48   : > { %p2806_p12 = pnand %p2804_p11, %p3108_p8 }
  0x4a   : > { %p2807_p13 = pneg %p2806_p12 }
  0x4c   : > { %p2812_p2 = pnand %p2810_p0, %p2807_p13 }
  0x4e   : > { %2815 = shalt.err (!%p2812_p2)
}
  0x4f   : > { %s2816_s22 = scalar_lea.vmem %s3098_s25, 2048  ;;  %p2824_p4 = scmp.lt.s32.totalorder %s3098_s25, %s3098_s25 }
  0x50   : > { %p2817_p5 = scmp.ne.s32.totalorder %s3098_s25, %s2816_s22  ;;  %p2825_p10 = scmp.lt.s32.totalorder %s2816_s22, %s2816_s22 }
  0x52   : > { %p2819_p7 = pnand %p2817_p5, %p3108_p8  ;;  %p2826_p11 = por %p2825_p10, %p2824_p4 }
  0x54   : > { %p2820_p9 = pneg %p2819_p7 }
  0x56   : > { %p2827_p12 = pnand %p2826_p11, %p2820_p9 }
  0x58   : > { %2830 = shalt.err (!%p2827_p12)
}
  0x59   : > { %2649 = dma.hbm_to_vmem [thread:$0]  (!%p3092_p6), %s3819_s3, 2048, %s3098_s25, [#allocation6], %s2968_s26, %s2968_s26, %s2969_s10  }
  0x5a   : > { %s2970_s9 = smov [#allocation10]   ;;  %s2831_s28 = scalar_lea.hbm %s3829_s13, 4096 }
  0x5b   : > { %s440_s11 = sshll.u32 %s2970_s9, 4  ;;  %p2832_p13 = scmp.ne.s32.totalorder %s3829_s13, %s2831_s28  ;;  %s441_s11 = int_to_ptr.vmem [resolvable:$true] %s440_s11 }
  0x5c   : > { %p2838_p5 = scmp.lt.u32.totalorder %s2831_s28, %s3829_s13 }
  0x5d   : > { %p2834_p0 = pnand %p2832_p13, %p3108_p8 }
  0x5f   : > { %p2835_p2 = pneg %p2834_p0 }
  0x61   : > { %p2840_p7 = pnand %p2838_p5, %p2835_p2 }
  0x63   : > { %2843 = shalt.err (!%p2840_p7)
}
  0x64   : > { %s2844_s25 = scalar_lea.vmem %s441_s11, 4096  ;;  %p2852_p11 = scmp.lt.s32.totalorder %s441_s11, %s441_s11 }
  0x65   : > { %p2845_p9 = scmp.ne.s32.totalorder %s441_s11, %s2844_s25  ;;  %p2853_p12 = scmp.lt.s32.totalorder %s2844_s25, %s2844_s25 }
  0x67   : > { %p2847_p4 = pnand %p2845_p9, %p3108_p8  ;;  %p2854_p1 = por %p2853_p12, %p2852_p11 }
  0x69   : > { %p2848_p10 = pneg %p2847_p4 }
  0x6b   : > { %p2855_p3 = pnand %p2854_p1, %p2848_p10 }
  0x6d   : > { %2858 = shalt.err (!%p2855_p3)
}
  0x6e   : > { %2655 = dma.hbm_to_vmem [thread:$0]  (!%p3092_p6), %s3829_s13, 4096, %s441_s11, [#allocation9], %s2968_s26, %s2968_s26, %s2969_s10  }
  0x6f   : > { %s1970_s23 = sadd.s32 4294967294, %s2963_s16   ;;  %s3207_s21 = sadd.s32 1, %s2963_s16  }
  0x70   : > { %s36_s9 = ssub.s32 %s2963_s16, %s3207_s21  ;;  %s39_s12 = sadd.s32 1, %s2959_s15 }
  0x71   : > { %p37_p1 = scmp.eq.s32.totalorder %s36_s9, 0  ;;  %p46_p3 = scmp.ne.s32.totalorder %s2959_s15, %s2955_s30 }
  0x72   : > { %p47_p8 = scmp.eq.s32.totalorder %s2963_s16, 0  ;;  %p52_p13 = scmp.ne.s32.totalorder %s2955_s30, %s2951_s29 }
  0x73   : > { %s3218_s27 = scalar_select %p37_p1, %s2959_s15, %s39_s12  }
  0x74   : > { %p3220_p0 = por %p47_p8, %p46_p3  ;;  %p3850_p2 = scmp.eq.s32.totalorder %s3076_s19, 0 }
  0x75   : > { %p349_p5 = scmp.eq.s32.totalorder %s3076_s19, 1  ;;  %p355_p7 = scmp.eq.s32.totalorder %s1970_s23, 1 }
  0x76   : > { %p3226_p6 = por %p3850_p2, %p52_p13  ;;  %p2668_p9 = scmp.lt.s32.totalorder %s2963_s16, 2 }
  0x77   : > { %s454_s10 = sand.u32 1, %s2959_s15   ;;  %p3233_p4 = por %p349_p5, %p46_p3 }
  0x78   : > { %p3237_p10 = por %p355_p7, %p52_p13  ;;  %s1977_s24 = sshll.u32 %s454_s10, 3 }
  0x79   : > { %s3852_s11 = scalar_select %p3233_p4, 1, 0 }
  0x7a   : > { %s3853_s17 = scalar_select %p3237_p10, 1, 0 }
  0x7b   : > { %s1978_s14 = sshll.u32 %s2963_s16, 7  ;;  %s458_s8 = scalar_lea.vmem [#allocation2], %s1977_s24 }
  0x7c   : > { %s3245_s18 = scalar_lea.hbm %s3816_s0, %s1978_s14  ;;  %s465_s23 = sshll.u32 %s458_s8, 4  ;;  %s3247_s23 = int_to_ptr.vmem [resolvable:$true] %s465_s23 }
  0x7d   : > { %p3251_p11 = pnand %p2668_p9, %p3220_p0  ;;  %s455_s12 = scalar_lea.sflag [#allocation3], %s454_s10 }
  0x7e   : > { %s2859_s2 = scalar_lea.hbm %s3245_s18, 128  ;;  %s2864_s22 = scalar_lea.hbm %s3816_s0, 256 }
  0x7f   : > { %p2860_p12 = scmp.ne.s32.totalorder %s3245_s18, %s2859_s2  ;;  %p2861_p1 = pneg %p3251_p11 }
  0x80   : > { %p2865_p13 = scmp.lt.u32.totalorder %s3245_s18, %s3816_s0  ;;  %p2866_p0 = scmp.lt.u32.totalorder %s2864_s22, %s2859_s2 }
  0x81   : > { %p2862_p3 = pnand %p2861_p1, %p2860_p12  ;;  %p2868_p5 = scmp.lt.u32.totalorder %s2859_s2, %s3245_s18 }
  0x82   : > { %p2867_p2 = por %p2866_p0, %p2865_p13 }
  0x83   : > { %p2863_p8 = pneg %p2862_p3 }
  0x84   : > { %p2869_p7 = por %p2868_p5, %p2867_p2 }
  0x86   : > { %p2870_p9 = pnand %p2869_p7, %p2863_p8 }
  0x88   : > { %2873 = shalt.err (!%p2870_p9)
}
  0x89   : > { %s2874_s10 = scalar_lea.vmem %s3247_s23, 128  ;;  %s2971_s8 = smov [#allocation2]  }
  0x8a   : > { %p2875_p12 = scmp.ne.s32.totalorder %s3247_s23, %s2874_s10  ;;  %s2879_s24 = sshll.u32 %s2971_s8, 4  ;;  %s2880_s24 = int_to_ptr.vmem [resolvable:$false] %s2879_s24 }
  0x8b   : > { %s2881_s14 = scalar_lea.vmem %s2880_s24, 256  ;;  %p2882_p4 = scmp.lt.s32.totalorder %s3247_s23, %s2880_s24 }
  0x8c   : > { %p2877_p3 = pnand %p2875_p12, %p2861_p1  ;;  %p2883_p13 = scmp.lt.s32.totalorder %s2881_s14, %s2874_s10 }
  0x8e   : > { %p2878_p10 = pneg %p2877_p3  ;;  %p2884_p0 = por %p2883_p13, %p2882_p4 }
  0x90   : > { %p2885_p2 = pnand %p2884_p0, %p2878_p10 }
  0x92   : > { %2888 = shalt.err (!%p2885_p2)
}
  0x93   : > { %2659 = dma.hbm_to_vmem [thread:$0]  (!%p3251_p11), %s3245_s18, 128, %s3247_s23, %s455_s12  }
  0x94   : > { %p3855_p8 = scmp.ne.s32.totalorder %s3845_s20, 0 }
  0x95   : > { %s3283_s2 = sand.u32 (!%p3855_p8), 1, %s2955_s30  }
  0x96   : > { %474 = sbr.rel (%p3855_p8) target bundleno = 2919 (0xb67), region = 76  ;;  %s3837_s22 = sshll.u32 (!%p3855_p8), %s3283_s2, 3 }
  0x97   : > { %s477_s28 = scalar_lea.sflag (!%p3855_p8), [#allocation3], %s3283_s2  ;;  %s480_s25 = scalar_lea.vmem (!%p3855_p8), [#allocation2], %s3837_s22 }
  0x9d   : > { %2934 = dma.done.wait (%p3226_p6), %s477_s28, 128  }
  0x9e   : > { %2936 = vsyncadd (%p3226_p6), %s477_s28, 4294967168  ;;  %p3856_p4 = scmp.eq.s32.totalorder %s3076_s19, 0 }
  0xa0   : > { %2938 = dma.done.wait (%p3856_p4), [#allocation6], 4096   ;;  %p3857_p10 = pmov %p3856_p4 }
  0xa1   : > { %p3858_p11 = pmov %p3856_p4 }
  0xa2   : > { %2940 = vsyncadd (%p3857_p10), [#allocation6], 4294963200 }
  0xa3   : > { %2942 = dma.done.wait (%p3858_p11), [#allocation9], 6144   ;;  %p3859_p1 = pmov %p3856_p4 }
  0xa4   : > { %v2972_v0 = vmov 0.0|0.0   ;;  %v3303_v1 = vld [vmem:[%s480_s25] sm:$0xff]  ;;  %v558_v2 = vld [vmem:[#allocation5] sm:$0xff]  ;;  %v559_v3 = vld [vmem:[#allocation5 + $0x8] sm:$0xff]  ;;  %vm2973_vm0 = vmmov 0   ;;  %v2974_v51 = vmov 0.0  }
  0xa5   : > { %2944 = vsyncadd (%p3859_p1), [#allocation9], 4294961152  ;;  %2383 = vmatprep.subr.bf16.mxu0 %v2972_v0  ;;  %2407 = vmatprep.subr.bf16.mxu1 %v2972_v0  ;;  %v542_v4 = vmul.f32 %v3303_v1, %v3303_v1  ;;  %v2384_v5 = vpack.c.bf16 %v559_v3, %v558_v2  ;;  %v644_v6 = vld [vmem:[#allocation7] sm:$0xff]  ;;  %v645_v7 = vld [vmem:[#allocation7 + $0x8] sm:$0xff]  ;;  %s3860_s9 = sld [smem:[#allocation17_spill]]  ;;  %s3861_s8 = sld [smem:[#allocation18_spill]] }
  0xa6   : > { %v560_v8 = vld [vmem:[#allocation5 + $0x10] sm:$0xff]  ;;  %v2408_v9 = vpack.c.bf16 %v645_v7, %v644_v6  ;;  %v561_v10 = vld [vmem:[#allocation5 + $0x18] sm:$0xff]  ;;  %v562_v15 = vld [vmem:[#allocation5 + $0x20] sm:$0xff]  ;;  %2185 = vmatprep.mubr.msk.f32.mxu0 %vm2973_vm0, %v2974_v51  ;;  %2220 = vmatprep.mubr.msk.f32.mxu1 %vm2973_vm0, %v2974_v51  ;;  %vm1022_vm1 = vcmask 261120   ;;  %s2975_s24 = smov 96   ;;  %s2976_s14 = smov 64  }
  0xa7   : > { %v646_v11 = vld [vmem:[#allocation7 + $0x10] sm:$0xff]  ;;  %v647_v12 = vld [vmem:[#allocation7 + $0x18] sm:$0xff]  ;;  %543 = vadd.xlane.f32.xlu0 %v542_v4  ;;  %2385 = vmatpush3.bf16.msra.mxu0 %v2384_v5  ;;  %v2387_v13 = vpack.c.bf16 %v561_v10, %v560_v8  ;;  %v563_v16 = vld [vmem:[#allocation5 + $0x28] sm:$0xff]  ;;  %vm1105_vm4 = vcmask 64512   ;;  %s2978_s28 = smov 32   ;;  %vm1416_vm5 = vcmask 523264  }
  0xa8   : > { %2409 = vmatpush3.bf16.msra.mxu1 %v2408_v9  ;;  %2386 = vmatprep.subr.bf16.mxu0 %v2972_v0  ;;  %v2411_v14 = vpack.c.bf16 %v647_v12, %v646_v11  ;;  %v648_v17 = vld [vmem:[#allocation7 + $0x20] sm:$0xff]  ;;  %v649_v18 = vld [vmem:[#allocation7 + $0x28] sm:$0xff]  ;;  %v2390_v19 = vpack.c.bf16 %v563_v16, %v562_v15  ;;  %v564_v21 = vld [vmem:[#allocation5 + $0x30] sm:$0xff]  ;;  %vm1418_vm6 = vcmask 785408   ;;  %s3862_s26 = sld [smem:[#allocation20_spill]]  ;;  %s3863_s10 = sld [smem:[#allocation21_spill]] }
  0xa9   : > { %2410 = vmatprep.subr.bf16.mxu1 %v2972_v0  ;;  %v2414_v20 = vpack.c.bf16 %v649_v18, %v648_v17  ;;  %v565_v22 = vld [vmem:[#allocation5 + $0x38] sm:$0xff]  ;;  %v650_v23 = vld [vmem:[#allocation7 + $0x30] sm:$0xff]  ;;  %v566_v27 = vld [vmem:[#allocation5 + $0x40] sm:$0xff]  ;;  %s3864_s22 = sld [smem:[#allocation19_spill]]  ;;  %s3865_s25 = sshll.u32 %s3283_s2, 3 }
  0xaa   : > { %v651_v24 = vld [vmem:[#allocation7 + $0x38] sm:$0xff]  ;;  %v2393_v25 = vpack.c.bf16 %v565_v22, %v564_v21  ;;  %v567_v28 = vld [vmem:[#allocation5 + $0x48] sm:$0xff]  ;;  %v652_v29 = vld [vmem:[#allocation7 + $0x40] sm:$0xff]  ;;  %s540_s20 = scalar_lea.vmem [#allocation11], %s3865_s25  ;;  %s3866_s12 = sld [smem:[#allocation22_spill]] }
  0xab   : > { %2388 = vmatpush3.bf16.msra.mxu0 %v2387_v13  ;;  %v2417_v26 = vpack.c.bf16 %v651_v24, %v650_v23  ;;  %v2396_v30 = vpack.c.bf16 %v567_v28, %v566_v27  ;;  %v653_v31 = vld [vmem:[#allocation7 + $0x48] sm:$0xff]  ;;  %v568_v33 = vld [vmem:[#allocation5 + $0x50] sm:$0xff]  ;;  %v569_v34 = vld [vmem:[#allocation5 + $0x58] sm:$0xff]  ;;  %s1862_s18 = sshll.u32 %s540_s20, 4  ;;  %p3867_p5 = scmp.ne.s32.totalorder %s3852_s11, 0  ;;  %s3774_s18 = int_to_ptr.vmem [resolvable:$true] %s1862_s18 }
  0xac   : > { %2412 = vmatpush3.bf16.msra.mxu1 %v2411_v14  ;;  %2389 = vmatprep.subr.bf16.mxu0 %v2972_v0  ;;  %v2420_v32 = vpack.c.bf16 %v653_v31, %v652_v29  ;;  %v654_v35 = vld [vmem:[#allocation7 + $0x50] sm:$0xff]  ;;  %v2399_v36 = vpack.c.bf16 %v569_v34, %v568_v33  ;;  %v655_v37 = vld [vmem:[#allocation7 + $0x58] sm:$0xff]  ;;  %v570_v39 = vld [vmem:[#allocation5 + $0x60] sm:$0xff] }
  0xad   : > { %2413 = vmatprep.subr.bf16.mxu1 %v2972_v0  ;;  %v2423_v38 = vpack.c.bf16 %v655_v37, %v654_v35  ;;  %v571_v40 = vld [vmem:[#allocation5 + $0x68] sm:$0xff]  ;;  %v656_v41 = vld [vmem:[#allocation7 + $0x60] sm:$0xff]  ;;  %v572_v45 = vld [vmem:[#allocation5 + $0x70] sm:$0xff] }
  0xae   : > { %v2402_v42 = vpack.c.bf16 %v571_v40, %v570_v39  ;;  %v657_v43 = vld [vmem:[#allocation7 + $0x68] sm:$0xff]  ;;  %v573_v46 = vld [vmem:[#allocation5 + $0x78] sm:$0xff]  ;;  %v658_v47 = vld [vmem:[#allocation7 + $0x70] sm:$0xff] }
  0xaf   : > { %2391 = vmatpush3.bf16.msra.mxu0 %v2390_v19  ;;  %v2426_v44 = vpack.c.bf16 %v657_v43, %v656_v41  ;;  %v2405_v48 = vpack.c.bf16 %v573_v46, %v572_v45  ;;  %v659_v49 = vld [vmem:[#allocation7 + $0x78] sm:$0xff]  ;;  %v730_v55 = vld [vmem:[%s3820_s4] sm:$0xff]  ;;  %v732_v2 = vld [vmem:[%s3820_s4 + $0x10] sm:$0xff] }
  0xb0   : > { %2415 = vmatpush3.bf16.msra.mxu1 %v2414_v20  ;;  %2392 = vmatprep.subr.bf16.mxu0 %v2972_v0  ;;  %v2429_v50 = vpack.c.bf16 %v659_v49, %v658_v47  ;;  %v731_v56 = vld [vmem:[%s3820_s4 + $0x8] sm:$0xff]  ;;  %v816_v57 = vld [vmem:[%s3821_s5] sm:$0xff]  ;;  %v733_v4 = vld [vmem:[%s3820_s4 + $0x18] sm:$0xff] }
  0xb1   : > { %2416 = vmatprep.subr.bf16.mxu1 %v2972_v0  ;;  %v817_v58 = vld [vmem:[%s3821_s5 + $0x8] sm:$0xff]  ;;  %v1986_v60 = vld [vmem:[%s3817_s1] ss:$0 sm:$0xff]  ;;  %v2432_v62 = vpack.c.bf16 %v731_v56, %v730_v55  ;;  %v818_v5 = vld [vmem:[%s3821_s5 + $0x10] sm:$0xff]  ;;  %v2435_v7 = vpack.c.bf16 %v733_v4, %v732_v2 }
  0xb2   : > { %v2456_v63 = vpack.c.bf16 %v817_v58, %v816_v57  ;;  %v819_v6 = vld [vmem:[%s3821_s5 + $0x18] sm:$0xff]  ;;  %v734_v9 = vld [vmem:[%s3820_s4 + $0x20] sm:$0xff]  ;;  %v735_v10 = vld [vmem:[%s3820_s4 + $0x28] sm:$0xff] }
  0xb3   : > { %2394 = vmatpush3.bf16.msra.mxu0 %v2393_v25  ;;  %v2459_v8 = vpack.c.bf16 %v819_v6, %v818_v5  ;;  %v820_v11 = vld [vmem:[%s3821_s5 + $0x20] sm:$0xff]  ;;  %v821_v12 = vld [vmem:[%s3821_s5 + $0x28] sm:$0xff]  ;;  %v2438_v13 = vpack.c.bf16 %v735_v10, %v734_v9  ;;  %v736_v15 = vld [vmem:[%s3820_s4 + $0x30] sm:$0xff] }
  0xb4   : > { %2418 = vmatpush3.bf16.msra.mxu1 %v2417_v26  ;;  %2395 = vmatprep.subr.bf16.mxu0 %v2972_v0  ;;  %v2462_v14 = vpack.c.bf16 %v821_v12, %v820_v11  ;;  %v737_v16 = vld [vmem:[%s3820_s4 + $0x38] sm:$0xff]  ;;  %v822_v17 = vld [vmem:[%s3821_s5 + $0x30] sm:$0xff]  ;;  %v738_v21 = vld [vmem:[%s3820_s4 + $0x40] sm:$0xff] }
  0xb5   : > { %2419 = vmatprep.subr.bf16.mxu1 %v2972_v0  ;;  %v823_v18 = vld [vmem:[%s3821_s5 + $0x38] sm:$0xff]  ;;  %v2441_v19 = vpack.c.bf16 %v737_v16, %v736_v15  ;;  %v739_v22 = vld [vmem:[%s3820_s4 + $0x48] sm:$0xff]  ;;  %v824_v23 = vld [vmem:[%s3821_s5 + $0x40] sm:$0xff] }
  0xb6   : > { %v2465_v20 = vpack.c.bf16 %v823_v18, %v822_v17  ;;  %v825_v24 = vld [vmem:[%s3821_s5 + $0x48] sm:$0xff]  ;;  %v2444_v25 = vpack.c.bf16 %v739_v22, %v738_v21  ;;  %v740_v27 = vld [vmem:[%s3820_s4 + $0x50] sm:$0xff]  ;;  %v741_v28 = vld [vmem:[%s3820_s4 + $0x58] sm:$0xff] }
  0xb7   : > { %2397 = vmatpush3.bf16.msra.mxu0 %v2396_v30  ;;  %v2468_v26 = vpack.c.bf16 %v825_v24, %v824_v23  ;;  %v826_v29 = vld [vmem:[%s3821_s5 + $0x50] sm:$0xff]  ;;  %v827_v30 = vld [vmem:[%s3821_s5 + $0x58] sm:$0xff]  ;;  %v2447_v31 = vpack.c.bf16 %v741_v28, %v740_v27  ;;  %v742_v33 = vld [vmem:[%s3820_s4 + $0x60] sm:$0xff]  ;;  %v996_v27 = vlaneseq }
  0xb8   : > { %2421 = vmatpush3.bf16.msra.mxu1 %v2420_v32  ;;  %2398 = vmatprep.subr.bf16.mxu0 %v2972_v0  ;;  %v2471_v32 = vpack.c.bf16 %v827_v30, %v826_v29  ;;  %v743_v34 = vld [vmem:[%s3820_s4 + $0x68] sm:$0xff]  ;;  %v828_v35 = vld [vmem:[%s3821_s5 + $0x60] sm:$0xff]  ;;  %v744_v39 = vld [vmem:[%s3820_s4 + $0x70] sm:$0xff] }
  0xb9   : > { %2422 = vmatprep.subr.bf16.mxu1 %v2972_v0  ;;  %v2450_v37 = vpack.c.bf16 %v743_v34, %v742_v33  ;;  %v745_v40 = vld [vmem:[%s3820_s4 + $0x78] sm:$0xff]  ;;  %v830_v41 = vld [vmem:[%s3821_s5 + $0x70] sm:$0xff]  ;;  %v902_v45 = vld [vmem:[%s3822_s6] sm:$0xff]  ;;  %v997_v28 = vshrl.u32 %v996_v27, 7  ;;  %v1014_v30 = vand.u32 127, %v996_v27 }
  0xba   : > { %v2453_v43 = vpack.c.bf16 %v745_v40, %v744_v39  ;;  %v903_v46 = vld [vmem:[%s3822_s6 + $0x8] sm:$0xff]  ;;  %v905_v49 = vld [vmem:[%s3822_s6 + $0x18] sm:$0xff]  ;;  %v908_v55 = vld [vmem:[%s3822_s6 + $0x30] sm:$0xff]  ;;  %v2977_v33 = vmov -1e+09  }
  0xbb   : > { %2400 = vmatpush3.bf16.msra.mxu0 %v2399_v36  ;;  %v829_v36 = vld [vmem:[%s3821_s5 + $0x68] sm:$0xff]  ;;  %v2480_v47 = vpack.c.bf16 %v903_v46, %v902_v45  ;;  %v909_v56 = vld [vmem:[%s3822_s6 + $0x38] sm:$0xff]  ;;  %v910_v58 = vld [vmem:[%s3822_s6 + $0x40] sm:$0xff]  ;;  %v998_v29 = vadd.s32 8, %v997_v28 }
  0xbc   : > { %2424 = vmatpush3.bf16.msra.mxu1 %v2423_v38  ;;  %2401 = vmatprep.subr.bf16.mxu0 %v2972_v0  ;;  %v2474_v38 = vpack.c.bf16 %v829_v36, %v828_v35  ;;  %v2489_v57 = vpack.c.bf16 %v909_v56, %v908_v55  ;;  %v914_v2 = vld [vmem:[%s3822_s6 + $0x60] sm:$0xff]  ;;  %v915_v4 = vld [vmem:[%s3822_s6 + $0x68] sm:$0xff]  ;;  %v916_v6 = vld [vmem:[%s3822_s6 + $0x70] sm:$0xff] }
  0xbd   : > { %2425 = vmatprep.subr.bf16.mxu1 %v2972_v0  ;;  %v2498_v5 = vpack.c.bf16 %v915_v4, %v914_v2  ;;  %v988_v9 = vld [vmem:[%s3860_s9] sm:$0xff] }
  0xbe   : > { %v989_v10 = vld [vmem:[%s3861_s8] sm:$0xff] }
  0xbf   : > { %2403 = vmatpush3.bf16.msra.mxu0 %v2402_v42  ;;  %v831_v42 = vld [vmem:[%s3821_s5 + $0x78] sm:$0xff]  ;;  %v1422_v27 = vld [vmem:[#allocation8 + $0x10] sm:$0xff] }
  0xc0   : > { %2427 = vmatpush3.bf16.msra.mxu1 %v2426_v44  ;;  %2404 = vmatprep.subr.bf16.mxu0 %v2972_v0  ;;  %v2477_v44 = vpack.c.bf16 %v831_v42, %v830_v41 }
  0xc1   : > { %2428 = vmatprep.subr.bf16.mxu1 %v2972_v0 }
  0xc3   : > { %2406 = vmatpush3.bf16.msra.mxu0 %v2405_v48  ;;  %v904_v48 = vld [vmem:[%s3822_s6 + $0x10] sm:$0xff] }
  0xc4   : > { %2430 = vmatpush3.bf16.msra.mxu1 %v2429_v50  ;;  %2431 = vmatprep.subr.bf16.mxu0 %v2972_v0  ;;  %v2483_v50 = vpack.c.bf16 %v905_v49, %v904_v48 }
  0xc5   : > { %2455 = vmatprep.subr.bf16.mxu1 %v2972_v0 }
 0x134   : > { %v544_v52 = vpop.xlane.xlu0 %543 }
 0x135   : > { %v546_v53 = vmul.f32 0.0078125, %v544_v52  ;;  %v906_v52 = vld [vmem:[%s3822_s6 + $0x20] sm:$0xff] }
 0x137   : > { %v547_v54 = vadd.f32 1e-06, %v546_v53  ;;  %v907_v53 = vld [vmem:[%s3822_s6 + $0x28] sm:$0xff] }
 0x139   : > { %2719 = vrsqrt.f32 %v547_v54  ;;  %v2486_v54 = vpack.c.bf16 %v907_v53, %v906_v52 }
 0x143   : > { %v2720_v59 = vpop.eup %2719 }
 0x144   : > { %v549_v61 = vmul.f32 %v2720_v59, %v3303_v1  ;;  %v911_v59 = vld [vmem:[%s3822_s6 + $0x48] sm:$0xff] }
 0x146   : > { %v3346_v3 = vmul.f32 %v1986_v60, %v549_v61  ;;  %v2492_v60 = vpack.c.bf16 %v911_v59, %v910_v58  ;;  %v912_v61 = vld [vmem:[%s3822_s6 + $0x50] sm:$0xff] }
 0x148   : > { %2186 = vmatmul.mubr.f32.vlgmr.msra.gmra.mrb[0].mxu0 %v3346_v3  ;;  %2221 = vmatmul.mubr.f32.vlgmr.msra.gmra.mrb[0].mxu1 %v3346_v3 }
 0x149   : > { %2433 = vmatpush3.bf16.msra.mxu0 %v2432_v62  ;;  %2457 = vmatpush3.bf16.msra.mxu1 %v2456_v63  ;;  %v913_v62 = vld [vmem:[%s3822_s6 + $0x58] sm:$0xff] }
 0x14a   : > { %2434 = vmatprep.subr.bf16.mxu0 %v2972_v0  ;;  %2458 = vmatprep.subr.bf16.mxu1 %v2972_v0  ;;  %v2495_v63 = vpack.c.bf16 %v913_v62, %v912_v61 }
 0x14b   : > { %2255 = vmatprep.mubr.msk.f32.mxu0 %vm2973_vm0, %v2974_v51  ;;  %2290 = vmatprep.mubr.msk.f32.mxu1 %vm2973_vm0, %v2974_v51 }
 0x14d   : > { %2436 = vmatpush3.bf16.msra.mxu0 %v2435_v7  ;;  %2460 = vmatpush3.bf16.msra.mxu1 %v2459_v8  ;;  %v917_v7 = vld [vmem:[%s3822_s6 + $0x78] sm:$0xff] }
 0x14e   : > { %2437 = vmatprep.subr.bf16.mxu0 %v2972_v0  ;;  %2461 = vmatprep.subr.bf16.mxu1 %v2972_v0  ;;  %v2501_v8 = vpack.c.bf16 %v917_v7, %v916_v6 }
 0x151   : > { %2439 = vmatpush3.bf16.msra.mxu0 %v2438_v13  ;;  %2463 = vmatpush3.bf16.msra.mxu1 %v2462_v14 }
 0x152   : > { %2440 = vmatprep.subr.bf16.mxu0 %v2972_v0  ;;  %2464 = vmatprep.subr.bf16.mxu1 %v2972_v0 }
 0x155   : > { %2442 = vmatpush3.bf16.msra.mxu0 %v2441_v19  ;;  %2466 = vmatpush3.bf16.msra.mxu1 %v2465_v20 }
 0x156   : > { %2443 = vmatprep.subr.bf16.mxu0 %v2972_v0  ;;  %2467 = vmatprep.subr.bf16.mxu1 %v2972_v0 }
 0x159   : > { %2445 = vmatpush3.bf16.msra.mxu0 %v2444_v25  ;;  %2469 = vmatpush3.bf16.msra.mxu1 %v2468_v26 }
 0x15a   : > { %2446 = vmatprep.subr.bf16.mxu0 %v2972_v0  ;;  %2470 = vmatprep.subr.bf16.mxu1 %v2972_v0 }
 0x15d   : > { %2448 = vmatpush3.bf16.msra.mxu0 %v2447_v31  ;;  %2472 = vmatpush3.bf16.msra.mxu1 %v2471_v32  ;;  %v1003_v31 = vand.u32 7, %v997_v28  ;;  %v1010_v32 = vand.u32 7, %v998_v29  ;;  %v1423_v29 = vld [vmem:[#allocation8 + $0x18] sm:$0xff] }
 0x15e   : > { %2449 = vmatprep.subr.bf16.mxu0 %v2972_v0  ;;  %2473 = vmatprep.subr.bf16.mxu1 %v2972_v0 }
 0x15f   : > { %vm1015_vm2 = vcmp.le.s32.totalorder %v1014_v30, %v1003_v31  ;;  %vm1016_vm3 = vcmp.le.s32.totalorder %v1014_v30, %v1010_v32  ;;  %v2507_v30 = vpack.c.bf16 %v1423_v29, %v1422_v27  ;;  %v1424_v31 = vld [vmem:[#allocation8 + $0x20] sm:$0xff]  ;;  %v1425_v32 = vld [vmem:[#allocation8 + $0x28] sm:$0xff]  ;;  %v1535_v29 = vld [vmem:[%s3862_s26 + $0x68] sm:$0xff] }
 0x160   : > { %v1017_v34 = vsel %vm1015_vm2, 0.0, %v2977_v33  ;;  %v1018_v36 = vsel %vm1016_vm3, 0.0, %v2977_v33  ;;  %v2510_v33 = vpack.c.bf16 %v1425_v32, %v1424_v31  ;;  %v1635_v27 = vld [vmem:[%s3863_s10 + $0x50] sm:$0xff]  ;;  %v1638_v31 = vld [vmem:[%s3863_s10 + $0x68] sm:$0xff] }
 0x161   : > { %2451 = vmatpush3.bf16.msra.mxu0 %v2450_v37  ;;  %2475 = vmatpush3.bf16.msra.mxu1 %v2474_v38 }
 0x162   : > { %2452 = vmatprep.subr.bf16.mxu0 %v2972_v0  ;;  %2476 = vmatprep.subr.bf16.mxu1 %v2972_v0 }
 0x165   : > { %2454 = vmatpush3.bf16.msra.mxu0 %v2453_v43  ;;  %2478 = vmatpush3.bf16.msra.mxu1 %v2477_v44 }
 0x166   : > { %2479 = vmatprep.subr.bf16.mxu0 %v2972_v0 }
 0x168   : > { %2256 = vmatmul.mubr.f32.vlgmr.msra.gmra.mrb[2].mxu0 %v3346_v3  ;;  %2291 = vmatmul.mubr.f32.vlgmr.msra.gmra.mrb[2].mxu1 %v3346_v3 }
 0x169   : > { %2481 = vmatpush3.bf16.msra.mxu0 %v2480_v47  ;;  %2325 = vmatprep.mubr.msk.f32.mxu0 %vm2973_vm0, %v2974_v51 }
 0x16a   : > { %2482 = vmatprep.subr.bf16.mxu0 %v2972_v0 }
 0x16d   : > { %2484 = vmatpush3.bf16.msra.mxu0 %v2483_v50 }
 0x16e   : > { %2485 = vmatprep.subr.bf16.mxu0 %v2972_v0 }
 0x171   : > { %2487 = vmatpush3.bf16.msra.mxu0 %v2486_v54 }
 0x172   : > { %2488 = vmatprep.subr.bf16.mxu0 %v2972_v0 }
 0x175   : > { %2490 = vmatpush3.bf16.msra.mxu0 %v2489_v57 }
 0x176   : > { %2491 = vmatprep.subr.bf16.mxu0 %v2972_v0 }
 0x179   : > { %2493 = vmatpush3.bf16.msra.mxu0 %v2492_v60 }
 0x17a   : > { %2494 = vmatprep.subr.bf16.mxu0 %v2972_v0 }
 0x17d   : > { %2496 = vmatpush3.bf16.msra.mxu0 %v2495_v63 }
 0x17e   : > { %2497 = vmatprep.subr.bf16.mxu0 %v2972_v0 }
 0x181   : > { %2499 = vmatpush3.bf16.msra.mxu0 %v2498_v5 }
 0x182   : > { %2500 = vmatprep.subr.bf16.mxu0 %v2972_v0 }
 0x185   : > { %2502 = vmatpush3.bf16.msra.mxu0 %v2501_v8 }
 0x188   : > { %2326 = vmatmul.mubr.f32.vlgmr.msra.gmra.mrb[4].mxu0 %v3346_v3 }
 0x189   : > { %1618 = vmatprep.mubr.f32.mxu0 %v2974_v51 }
 0x21b   : > { %v640_v11 = vpop.f32.mrb[0].mxu0  ;;  %v726_v12 = vpop.f32.mrb[0].mxu1 }
 0x21c   : > { %v990_v13 = vmul.f32 %v988_v9, %v640_v11  ;;  %v991_v14 = vmul.f32 %v989_v10, %v726_v12  ;;  %v2187_v15 = vpop.f32.mrb[1].mxu0  ;;  %v2222_v16 = vpop.f32.mrb[1].mxu1 }
 0x21e   : > { %v992_v17 = vadd.f32 %v991_v14, %v990_v13 }
 0x220   : > { %1020 = vrot.lane.b32.xlu0 %v992_v17, %s2975_s24  ;;  %2330 = vmatprep.mubr.msk.f32.mxu1 %vm1022_vm1, %v992_v17 }
 0x224   : > { %1209 = vrot.lane.b32.xlu0 %v992_v17, %s2976_s14 }
 0x23b   : > { %v812_v3 = vpop.f32.mrb[2].mxu0  ;;  %v898_v18 = vpop.f32.mrb[2].mxu1 }
 0x23c   : > { %v993_v19 = vmul.f32 %v988_v9, %v812_v3  ;;  %v994_v20 = vmul.f32 %v989_v10, %v898_v18  ;;  %v2257_v21 = vpop.f32.mrb[3].mxu0  ;;  %v2292_v22 = vpop.f32.mrb[3].mxu1 }
 0x23e   : > { %v995_v23 = vadd.f32 %v994_v20, %v993_v19 }
 0x240   : > { %2328 = vmatprep.subr.msk.mxu1 %vm1022_vm1, %v995_v23 }
 0x241   : > { %2329 = vmatpush3.xpose.msk.msra.mxu1 %vm1022_vm1, %v995_v23 }
 0x25b   : > { %v3522_v24 = vpop.f32.mrb[4].mxu0 }
 0x25c   : > { %v2327_v25 = vpop.f32.mrb[5].mxu0  ;;  %2333 = vmatprep.subr.mxu1 %v3522_v24 }
 0x25d   : > { %v1420_v25 = vld [vmem:[#allocation8] sm:$0xff] }
 0x292   : > { %v1021_v26 = vpop.permute.xlu0 %1020 }
 0x293   : > { %1211 = vrot.lane.b32.xlu0 %v1021_v26, %s2976_s14  ;;  %2331 = vmatmul.mubr.msk.f32.vlgmr.msra.gmra.mrb[4].mxu1 %vm1022_vm1, %v1021_v26  ;;  %v1421_v26 = vld [vmem:[#allocation8 + $0x8] sm:$0xff] }
 0x294   : > { %2334 = vmatpush3.msra.mxu1 %v3522_v24  ;;  %v2504_v28 = vpack.c.bf16 %v1421_v26, %v1420_v25  ;;  %v1532_v25 = vld [vmem:[%s3862_s26 + $0x50] sm:$0xff]  ;;  %v1633_v26 = vld [vmem:[%s3863_s10 + $0x40] sm:$0xff] }
 0x295   : > { %v2569_v32 = vpack.c.bf16 %v1635_v27, %v1633_v26  ;;  %v1653_v26 = vld [vmem:[%s3863_s10 + $0xe0] sm:$0xff]  ;;  %v1655_v27 = vld [vmem:[%s3863_s10 + $0xf0] sm:$0xff] }
 0x296   : > { %v1210_v60 = vpop.permute.xlu0 %1209 }
 0x305   : > { %v1212_v61 = vpop.permute.xlu0 %1211 }
 0x366   : > { %v2332_v35 = vpop.f32.mrb[4].mxu1 }
 0x367   : > { %v1096_v37 = vpop.f32.mrb[5].mxu1  ;;  %v1102_v39 = vadd.f32 %v2332_v35, %v1018_v36  ;;  %v1427_v35 = vld [vmem:[#allocation8 + $0x38] sm:$0xff] }
 0x368   : > { %v1097_v38 = vadd.f32 %v1096_v37, %v1017_v34  ;;  %v1428_v37 = vld [vmem:[#allocation8 + $0x40] sm:$0xff] }
 0x369   : > { %v1109_v41 = vsel %vm1105_vm4, %v1102_v39, -inf }
 0x36a   : > { %v1106_v40 = vsel %vm1105_vm4, %v1097_v38, -inf }
 0x36b   : > { %1107 = vmax.xlane.f32.xlu1 %v1106_v40  ;;  %v1430_v40 = vld [vmem:[#allocation8 + $0x50] sm:$0xff] }
 0x36f   : > { %1110 = vmax.xlane.f32.xlu1 %v1109_v41  ;;  %v1431_v41 = vld [vmem:[#allocation8 + $0x58] sm:$0xff] }
 0x3f8   : > { %v1108_v42 = vpop.xlane.xlu1 %1107 }
 0x3f9   : > { %v1112_v43 = vsub.f32 %v1097_v38, %v1108_v42  ;;  %v1429_v38 = vld [vmem:[#allocation8 + $0x48] sm:$0xff]  ;;  %v2519_v42 = vpack.c.bf16 %v1431_v41, %v1430_v40  ;;  %v1534_v40 = vld [vmem:[%s3862_s26 + $0x60] sm:$0xff]  ;;  %v1536_v41 = vld [vmem:[%s3862_s26 + $0x70] sm:$0xff] }
 0x3fb   : > { %v1114_v46 = vmul.f32 1.442695, %v1112_v43  ;;  %v1432_v43 = vld [vmem:[#allocation8 + $0x60] sm:$0xff] }
 0x3fc   : > { %v1111_v44 = vpop.xlane.xlu1 %1110 }
 0x3fd   : > { %v1113_v45 = vsub.f32 %v1102_v39, %v1111_v44  ;;  %v2516_v39 = vpack.c.bf16 %v1429_v38, %v1428_v37  ;;  %v1433_v44 = vld [vmem:[#allocation8 + $0x68] sm:$0xff] }
 0x3ff   : > { %v1116_v47 = vmul.f32 1.442695, %v1113_v45  ;;  %v2522_v45 = vpack.c.bf16 %v1433_v44, %v1432_v43  ;;  %v2541_v43 = vpack.c.bf16 %v1536_v41, %v1534_v40  ;;  %v1744_v41 = vld [vmem:[#allocation10] sm:$0xff] }
 0x401   : > { %2721 = vpow2.f32 %v1116_v47  ;;  %v1435_v47 = vld [vmem:[#allocation8 + $0x78] sm:$0xff] }
 0x402   : > { %2723 = vpow2.f32 %v1114_v46  ;;  %v1434_v46 = vld [vmem:[#allocation8 + $0x70] sm:$0xff] }
 0x40b   : > { %v2722_v48 = vpop.eup %2721 }
 0x40c   : > { %v1121_v49 = vsel %vm1105_vm4, %v2722_v48, 0.0  ;;  %v2724_v50 = vpop.eup %2723 }
 0x40d   : > { %1122 = vadd.xlane.f32.xlu1 %v1121_v49  ;;  %v1118_v52 = vsel %vm1105_vm4, %v2724_v50, 0.0 }
 0x411   : > { %1119 = vadd.xlane.f32.xlu1 %v1118_v52 }
 0x422   : > { %1213 = vrot.lane.b32.xlu1 %v995_v23, %s2975_s24 }
 0x49a   : > { %v1123_v53 = vpop.xlane.xlu1 %1122 }
 0x49b   : > { %2725 = vrcp.f32 %v1123_v53 }
 0x49e   : > { %v1120_v54 = vpop.xlane.xlu1 %1119 }
 0x49f   : > { %2727 = vrcp.f32 %v1120_v54 }
 0x4a2   : > { %v1214_v55 = vpop.permute.xlu1 %1213 }
 0x4a3   : > { %2338 = vmatprep.subr.msk.mxu1 %vm1022_vm1, %v1214_v55 }
 0x4a5   : > { %v2726_v56 = vpop.eup %2725 }
 0x4a6   : > { %v1127_v59 = vmul.f32 %v2726_v56, %v2722_v48  ;;  %v2525_v48 = vpack.c.bf16 %v1435_v47, %v1434_v46  ;;  %v1541_v46 = vld [vmem:[%s3862_s26 + $0x98] sm:$0xff]  ;;  %v1642_v47 = vld [vmem:[%s3863_s10 + $0x88] sm:$0xff] }
 0x4a9   : > { %v2728_v57 = vpop.eup %2727 }
 0x4aa   : > { %v1126_v58 = vmul.f32 %v2728_v57, %v2724_v50  ;;  %v1523_v57 = vld [vmem:[%s3862_s26 + $0x8] sm:$0xff] }
 0x4ac   : > { %2335 = vmatprep.mubr.msk.f32.mxu1 %vm1105_vm4, %v1126_v58  ;;  %v1525_v58 = vld [vmem:[%s3862_s26 + $0x18] sm:$0xff] }
 0x4ad   : > { %2336 = vmatmul.mubr.msk.f32.vlgmr.msra.gmra.mrb[6].mxu1 %vm1105_vm4, %v1127_v59  ;;  %v1626_v59 = vld [vmem:[%s3863_s10 + $0x8] sm:$0xff] }
 0x4ae   : > { %2339 = vmatpush3.xpose.msk.msra.mxu1 %vm1022_vm1, %v1214_v55  ;;  %2340 = vmatprep.mubr.msk.f32.mxu1 %vm1022_vm1, %v1210_v60  ;;  %v2527_v60 = vpack.c.bf16 %v1525_v58, %v1523_v57  ;;  %v1543_v57 = vld [vmem:[%s3862_s26 + $0xa8] sm:$0xff]  ;;  %v1545_v58 = vld [vmem:[%s3862_s26 + $0xb8] sm:$0xff] }
 0x4b0   : > { %2528 = vmatprep.subr.bf16.mxu0 %v2527_v60  ;;  %v2547_v60 = vpack.c.bf16 %v1545_v58, %v1543_v57  ;;  %v1750_v58 = vld [vmem:[#allocation10 + $0x30] sm:$0xff] }
 0x4b1   : > { %2341 = vmatmul.mubr.msk.f32.vlgmr.msra.gmra.mrb[8].mxu1 %vm1022_vm1, %v1212_v61  ;;  %v1628_v61 = vld [vmem:[%s3863_s10 + $0x18] sm:$0xff] }
 0x580   : > { %v2337_v62 = vpop.f32.mrb[6].mxu1 }
 0x581   : > { %v3539_v63 = vpop.f32.mrb[7].mxu1 }
 0x584   : > { %v2342_v2 = vpop.f32.mrb[8].mxu1 }
 0x585   : > { %v1293_v4 = vadd.f32 %v2342_v2, %v1018_v36  ;;  %v1287_v5 = vpop.f32.mrb[9].mxu1 }
 0x586   : > { %v1288_v6 = vadd.f32 %v1287_v5, %v1017_v34  ;;  %v1426_v34 = vld [vmem:[#allocation8 + $0x30] sm:$0xff]  ;;  %v1627_v5 = vld [vmem:[%s3863_s10 + $0x10] sm:$0xff] }
 0x587   : > { %v1299_v7 = vsel %vm1105_vm4, %v1293_v4, -inf  ;;  %v2513_v36 = vpack.c.bf16 %v1427_v35, %v1426_v34  ;;  %v1640_v34 = vld [vmem:[%s3863_s10 + $0x78] sm:$0xff] }
 0x588   : > { %1300 = vmax.xlane.f32.xlu0 %v1299_v7  ;;  %v1296_v8 = vsel %vm1105_vm4, %v1288_v6, -inf  ;;  %v2571_v35 = vpack.c.bf16 %v1640_v34, %v1638_v31  ;;  %v1997_v34 = vld [vmem:[%s3864_s22] ss:$0 sm:$0xff] }
 0x589   : > { %1297 = vmax.xlane.f32.xlu1 %v1296_v8  ;;  %v1529_v8 = vld [vmem:[%s3862_s26 + $0x38] sm:$0xff] }
 0x59a   : > { %1319 = vrot.lane.b32.xlu1 %v3522_v24, %s2975_s24 }
 0x615   : > { %v1301_v9 = vpop.xlane.xlu0 %1300 }
 0x616   : > { %v1303_v10 = vsub.f32 %v1293_v4, %v1301_v9  ;;  %v1298_v11 = vpop.xlane.xlu1 %1297  ;;  %v1625_v4 = vld [vmem:[%s3863_s10] sm:$0xff]  ;;  %v1630_v9 = vld [vmem:[%s3863_s10 + $0x28] sm:$0xff] }
 0x617   : > { %v1302_v12 = vsub.f32 %v1288_v6, %v1298_v11  ;;  %v1527_v6 = vld [vmem:[%s3862_s26 + $0x28] sm:$0xff]  ;;  %v2561_v7 = vpack.c.bf16 %v1627_v5, %v1625_v4  ;;  %v1645_v4 = vld [vmem:[%s3863_s10 + $0xa0] sm:$0xff]  ;;  %v1647_v5 = vld [vmem:[%s3863_s10 + $0xb0] sm:$0xff] }
 0x618   : > { %v1306_v13 = vmul.f32 1.442695, %v1303_v10  ;;  %v1632_v10 = vld [vmem:[%s3863_s10 + $0x38] sm:$0xff]  ;;  %v2531_v11 = vpack.c.bf16 %v1529_v8, %v1527_v6  ;;  %v1547_v6 = vld [vmem:[%s3862_s26 + $0xc8] sm:$0xff] }
 0x619   : > { %v1304_v14 = vmul.f32 1.442695, %v1302_v12  ;;  %v2563_v12 = vpack.c.bf16 %v1632_v10, %v1630_v9  ;;  %v1549_v8 = vld [vmem:[%s3862_s26 + $0xd8] sm:$0xff]  ;;  %v1650_v9 = vld [vmem:[%s3863_s10 + $0xc8] sm:$0xff] }
 0x61a   : > { %v1320_v15 = vpop.permute.xlu1 %1319  ;;  %v1652_v10 = vld [vmem:[%s3863_s10 + $0xd8] sm:$0xff] }
 0x61b   : > { %2729 = vpow2.f32 %v1304_v14  ;;  %2343 = vmatprep.subr.mxu1 %v1320_v15  ;;  %v1528_v14 = vld [vmem:[%s3862_s26 + $0x30] sm:$0xff] }
 0x61c   : > { %2344 = vmatpush3.msra.mxu1 %v1320_v15  ;;  %2731 = vpow2.f32 %v1306_v13  ;;  %v1526_v13 = vld [vmem:[%s3862_s26 + $0x20] sm:$0xff] }
 0x61d   : > { %2503 = vmatprep.subr.bf16.mxu1 %v2972_v0  ;;  %v1629_v15 = vld [vmem:[%s3863_s10 + $0x20] sm:$0xff] }
 0x625   : > { %v2730_v16 = vpop.eup %2729 }
 0x626   : > { %v1308_v17 = vsel %vm1105_vm4, %v2730_v16, 0.0  ;;  %v2732_v3 = vpop.eup %2731 }
 0x627   : > { %1309 = vadd.xlane.f32.xlu0 %v1308_v17  ;;  %v1311_v18 = vsel %vm1105_vm4, %v2732_v3, 0.0  ;;  %v1631_v17 = vld [vmem:[%s3863_s10 + $0x30] sm:$0xff] }
 0x62b   : > { %1312 = vadd.xlane.f32.xlu0 %v1311_v18  ;;  %v1533_v18 = vld [vmem:[%s3862_s26 + $0x58] sm:$0xff] }
 0x641   : > { %1404 = vrot.lane.b32.xlu0 %v2337_v62, %s2978_s28  ;;  %v1524_v62 = vld [vmem:[%s3862_s26 + $0x10] sm:$0xff]  ;;  %s2001_s28 = sshll.u32 %s3076_s19, 7  ;;  %s2979_s19 = smov [#allocation11]  }
 0x642   : > { %s3772_s8 = scalar_lea.hbm %s3866_s12, %s2001_s28  ;;  %s2893_s22 = sshll.u32 %s2979_s19, 4  ;;  %s2894_s22 = int_to_ptr.vmem [resolvable:$false] %s2893_s22 }
 0x643   : > { %s2895_s25 = scalar_lea.vmem %s2894_s22, 256  ;;  %p2896_p12 = scmp.lt.s32.totalorder %s3774_s18, %s2894_s22 }
 0x6b4   : > { %v1310_v19 = vpop.xlane.xlu0 %1309 }
 0x6b5   : > { %2733 = vrcp.f32 %v1310_v19  ;;  %v2565_v19 = vpack.c.bf16 %v1631_v17, %v1629_v15  ;;  %v1649_v15 = vld [vmem:[%s3863_s10 + $0xc0] sm:$0xff]  ;;  %v1651_v17 = vld [vmem:[%s3863_s10 + $0xd0] sm:$0xff] }
 0x6b8   : > { %v1313_v20 = vpop.xlane.xlu0 %1312 }
 0x6b9   : > { %2735 = vrcp.f32 %v1313_v20 }
 0x6bc   : > { %v1405_v52 = vpop.permute.xlu0 %1404 }
 0x6bd   : > { %v1415_v54 = vsel %vm1022_vm1, %v3539_v63, %v1405_v52  ;;  %v2559_v63 = vpack.c.bf16 %v1628_v61, %v1626_v59  ;;  %v1540_v52 = vld [vmem:[%s3862_s26 + $0x90] sm:$0xff]  ;;  %v1646_v59 = vld [vmem:[%s3863_s10 + $0xa8] sm:$0xff]  ;;  %v1648_v61 = vld [vmem:[%s3863_s10 + $0xb8] sm:$0xff] }
 0x6bf   : > { %v2734_v21 = vpop.eup %2733 }
 0x6c0   : > { %v1316_v22 = vmul.f32 %v2734_v21, %v2730_v16  ;;  %v2533_v16 = vpack.c.bf16 %v1528_v14, %v1526_v13  ;;  %v1634_v21 = vld [vmem:[%s3863_s10 + $0x48] sm:$0xff]  ;;  %v1546_v13 = vld [vmem:[%s3862_s26 + $0xc0] sm:$0xff]  ;;  %v1548_v14 = vld [vmem:[%s3862_s26 + $0xd0] sm:$0xff] }
 0x6c2   : > { %2345 = vmatprep.mubr.msk.f32.mxu1 %vm1105_vm4, %v1316_v22  ;;  %v1636_v22 = vld [vmem:[%s3863_s10 + $0x58] sm:$0xff] }
 0x6c3   : > { %v2736_v23 = vpop.eup %2735 }
 0x6c4   : > { %v1317_v24 = vmul.f32 %v2736_v23, %v2732_v3  ;;  %v1531_v3 = vld [vmem:[%s3862_s26 + $0x48] sm:$0xff]  ;;  %v1530_v23 = vld [vmem:[%s3862_s26 + $0x40] sm:$0xff] }
 0x6c5   : > { %v2535_v20 = vpack.c.bf16 %v1533_v18, %v1531_v3  ;;  %v1551_v3 = vld [vmem:[%s3862_s26 + $0xe8] sm:$0xff]  ;;  %v1553_v18 = vld [vmem:[%s3862_s26 + $0xf8] sm:$0xff] }
 0x6c6   : > { %2346 = vmatmul.mubr.msk.f32.vlgmr.msra.gmra.mrb[10].mxu1 %vm1105_vm4, %v1317_v24  ;;  %v2567_v24 = vpack.c.bf16 %v1636_v22, %v1634_v21  ;;  %v1654_v21 = vld [vmem:[%s3863_s10 + $0xe8] sm:$0xff]  ;;  %v1656_v22 = vld [vmem:[%s3863_s10 + $0xf8] sm:$0xff] }
 0x6c7   : > { %2380 = vmatprep.mubr.msk.f32.mxu1 %vm2973_vm0, %v2974_v51  ;;  %2505 = vmatpush3.bf16.msra.mxu1 %v2504_v28  ;;  %v2537_v28 = vpack.c.bf16 %v1532_v25, %v1530_v23  ;;  %v1550_v23 = vld [vmem:[%s3862_s26 + $0xe0] sm:$0xff]  ;;  %v1552_v25 = vld [vmem:[%s3862_s26 + $0xf0] sm:$0xff] }
 0x6c8   : > { %2506 = vmatprep.subr.bf16.mxu1 %v2972_v0 }
 0x6cb   : > { %2508 = vmatpush3.bf16.msra.mxu1 %v2507_v30  ;;  %v1537_v30 = vld [vmem:[%s3862_s26 + $0x78] sm:$0xff] }
 0x6cc   : > { %2509 = vmatprep.subr.bf16.mxu1 %v2972_v0 }
 0x6cf   : > { %2511 = vmatpush3.bf16.msra.mxu1 %v2510_v33  ;;  %v2539_v33 = vpack.c.bf16 %v1537_v30, %v1535_v29  ;;  %v2589_v29 = vpack.c.bf16 %v1655_v27, %v1653_v26 }
 0x6d0   : > { %2512 = vmatprep.subr.bf16.mxu1 %v2972_v0 }
 0x6d3   : > { %2514 = vmatpush3.bf16.msra.mxu1 %v2513_v36 }
 0x6d4   : > { %2515 = vmatprep.subr.bf16.mxu1 %v2972_v0 }
 0x6d7   : > { %2517 = vmatpush3.bf16.msra.mxu1 %v2516_v39 }
 0x6d8   : > { %2518 = vmatprep.subr.bf16.mxu1 %v2972_v0 }
 0x6db   : > { %2520 = vmatpush3.bf16.msra.mxu1 %v2519_v42  ;;  %v1637_v42 = vld [vmem:[%s3863_s10 + $0x60] sm:$0xff] }
 0x6dc   : > { %2521 = vmatprep.subr.bf16.mxu1 %v2972_v0 }
 0x6df   : > { %2523 = vmatpush3.bf16.msra.mxu1 %v2522_v45  ;;  %v1539_v45 = vld [vmem:[%s3862_s26 + $0x88] sm:$0xff] }
 0x6e0   : > { %2524 = vmatprep.subr.bf16.mxu1 %v2972_v0 }
 0x6e3   : > { %2526 = vmatpush3.bf16.msra.mxu1 %v2525_v48  ;;  %v2543_v48 = vpack.c.bf16 %v1541_v46, %v1539_v45  ;;  %v1746_v46 = vld [vmem:[#allocation10 + $0x10] sm:$0xff] }
 0x6e4   : > { %2560 = vmatprep.subr.bf16.mxu1 %v2559_v63  ;;  %v2579_v63 = vpack.c.bf16 %v1648_v61, %v1646_v59  ;;  %v1751_v59 = vld [vmem:[#allocation10 + $0x38] sm:$0xff]  ;;  %v1768_v61 = vld [vmem:[#allocation10 + $0xc0] sm:$0xff] }
 0x799   : > { %v2347_v49 = vpop.f32.mrb[10].mxu1 }
 0x79a   : > { %v1394_v50 = vpop.f32.mrb[11].mxu1 }
 0x79b   : > { %1408 = vrot.lane.b32.xlu1 %v1394_v50, %s2976_s14  ;;  %v1538_v50 = vld [vmem:[%s3862_s26 + $0x80] sm:$0xff]  ;;  %s2889_s14 = scalar_lea.vmem %s3774_s18, 128 }
 0x79c   : > { %p2890_p6 = scmp.ne.s32.totalorder %s3774_s18, %s2889_s14  ;;  %p2897_p3 = scmp.lt.s32.totalorder %s2895_s25, %s2889_s14 }
 0x79e   : > { %p2891_p7 = pnand %p2890_p6, %p3867_p5  ;;  %p2898_p13 = por %p2897_p3, %p2896_p12 }
 0x79f   : > { %1412 = vrot.lane.b32.xlu1 %v2347_v49, %s2975_s24  ;;  %v1644_v49 = vld [vmem:[%s3863_s10 + $0x98] sm:$0xff]  ;;  %s1849_s24 = scalar_lea.sflag [#allocation4], %s3283_s2 }
 0x7a0   : > { %p2892_p9 = pneg %p2891_p7 }
 0x7a2   : > { %p2899_p0 = pnand %p2898_p13, %p2892_p9 }
 0x80d   : > { %v1409_v53 = vpop.permute.xlu1 %1408 }
 0x80e   : > { %v1417_v55 = vsel %vm1416_vm5, %v1415_v54, %v1409_v53  ;;  %v2575_v53 = vpack.c.bf16 %v1644_v49, %v1642_v47  ;;  %v2545_v54 = vpack.c.bf16 %v1540_v52, %v1538_v50  ;;  %v1747_v47 = vld [vmem:[#allocation10 + $0x18] sm:$0xff]  ;;  %v1764_v49 = vld [vmem:[#allocation10 + $0xa0] sm:$0xff]  ;;  %v1765_v50 = vld [vmem:[#allocation10 + $0xa8] sm:$0xff] }
 0x80f   : > { %v2599_v52 = vpack.c.bf16 %v1765_v50, %v1764_v49 }
 0x811   : > { %v1413_v56 = vpop.permute.xlu1 %1412 }
 0x812   : > { %v1419_v0 = vsel %vm1418_vm6, %v1417_v55, %v1413_v56  ;;  %v1641_v55 = vld [vmem:[%s3863_s10 + $0x80] sm:$0xff]  ;;  %v1643_v56 = vld [vmem:[%s3863_s10 + $0x90] sm:$0xff] }
 0x813   : > { %2381 = vmatmul.mubr.f32.vlgmr.msra.gmra.mrb[12].mxu1 %v1419_v0  ;;  %v2577_v0 = vpack.c.bf16 %v1643_v56, %v1641_v55  ;;  %v1766_v56 = vld [vmem:[#allocation10 + $0xb0] sm:$0xff] }
 0x814   : > { %1721 = vmatprep.mubr.f32.mxu1 %v2974_v51  ;;  %v1522_v51 = vld [vmem:[%s3862_s26] sm:$0xff]  ;;  %2562 = vmatpush1.bf16.msra.mxu1 %v2561_v7  ;;  %v2581_v7 = vpack.c.bf16 %v1647_v5, %v1645_v4 }
 0x815   : > { %v2529_v2 = vpack.c.bf16 %v1524_v62, %v1522_v51  ;;  %2564 = vmatprep.subr.bf16.mxu1 %v2563_v12  ;;  %v1542_v51 = vld [vmem:[%s3862_s26 + $0xa0] sm:$0xff]  ;;  %v1544_v62 = vld [vmem:[%s3862_s26 + $0xb0] sm:$0xff]  ;;  %v2583_v12 = vpack.c.bf16 %v1652_v10, %v1650_v9  ;;  %v1755_v9 = vld [vmem:[#allocation10 + $0x58] sm:$0xff] }
 0x816   : > { %v1770_v5 = vld [vmem:[#allocation10 + $0xd0] sm:$0xff] }
 0x817   : > { %2530 = vmatpush1.bf16.msra.mxu0 %v2529_v2  ;;  %v2549_v2 = vpack.c.bf16 %v1544_v62, %v1542_v51  ;;  %v1769_v51 = vld [vmem:[#allocation10 + $0xc8] sm:$0xff] }
 0x818   : > { %2532 = vmatprep.subr.bf16.mxu0 %v2531_v11  ;;  %2566 = vmatpush1.bf16.msra.mxu1 %v2565_v19  ;;  %v2551_v11 = vpack.c.bf16 %v1549_v8, %v1547_v6  ;;  %v2585_v19 = vpack.c.bf16 %v1651_v17, %v1649_v15  ;;  %v2607_v62 = vpack.c.bf16 %v1769_v51, %v1768_v61  ;;  %v1771_v6 = vld [vmem:[#allocation10 + $0xd8] sm:$0xff]  ;;  %v1754_v8 = vld [vmem:[#allocation10 + $0x50] sm:$0xff]  ;;  %v1757_v15 = vld [vmem:[#allocation10 + $0x68] sm:$0xff] }
 0x819   : > { %2568 = vmatprep.subr.bf16.mxu1 %v2567_v24  ;;  %v2587_v24 = vpack.c.bf16 %v1656_v22, %v1654_v21  ;;  %v2613_v10 = vpack.c.bf16 %v1755_v9, %v1754_v8  ;;  %v1774_v17 = vld [vmem:[#allocation10 + $0xf0] sm:$0xff] }
 0x81b   : > { %2534 = vmatpush1.bf16.msra.mxu0 %v2533_v16  ;;  %v2553_v16 = vpack.c.bf16 %v1548_v14, %v1546_v13  ;;  %v1756_v14 = vld [vmem:[#allocation10 + $0x60] sm:$0xff] }
 0x81c   : > { %2536 = vmatprep.subr.bf16.mxu0 %v2535_v20  ;;  %2570 = vmatpush1.bf16.msra.mxu1 %v2569_v32  ;;  %v2555_v20 = vpack.c.bf16 %v1553_v18, %v1551_v3  ;;  %v1775_v3 = vld [vmem:[#allocation10 + $0xf8] sm:$0xff] }
 0x81d   : > { %2572 = vmatprep.subr.bf16.mxu1 %v2571_v35  ;;  %v2619_v18 = vpack.c.bf16 %v1775_v3, %v1774_v17 }
 0x81f   : > { %2538 = vmatpush1.bf16.msra.mxu0 %v2537_v28  ;;  %v2557_v28 = vpack.c.bf16 %v1552_v25, %v1550_v23 }
 0x820   : > { %2540 = vmatprep.subr.bf16.mxu0 %v2539_v33 }
 0x823   : > { %2542 = vmatpush1.bf16.msra.mxu0 %v2541_v43 }
 0x824   : > { %2544 = vmatprep.subr.bf16.mxu0 %v2543_v48  ;;  %v2597_v48 = vpack.c.bf16 %v1747_v47, %v1746_v46 }
 0x827   : > { %2546 = vmatpush1.bf16.msra.mxu0 %v2545_v54  ;;  %v1749_v54 = vld [vmem:[#allocation10 + $0x28] sm:$0xff] }
 0x828   : > { %2548 = vmatprep.subr.bf16.mxu0 %v2547_v60  ;;  %v2605_v60 = vpack.c.bf16 %v1751_v59, %v1750_v58 }
 0x82b   : > { %2550 = vmatpush1.bf16.msra.mxu0 %v2549_v2  ;;  %v1753_v2 = vld [vmem:[#allocation10 + $0x48] sm:$0xff] }
 0x82c   : > { %2552 = vmatprep.subr.bf16.mxu0 %v2551_v11  ;;  %v1772_v11 = vld [vmem:[#allocation10 + $0xe0] sm:$0xff] }
 0x82f   : > { %2554 = vmatpush1.bf16.msra.mxu0 %v2553_v16  ;;  %v2617_v16 = vpack.c.bf16 %v1757_v15, %v1756_v14 }
 0x830   : > { %2556 = vmatprep.subr.bf16.mxu0 %v2555_v20  ;;  %v1759_v20 = vld [vmem:[#allocation10 + $0x78] sm:$0xff] }
 0x833   : > { %2558 = vmatpush1.bf16.msra.mxu0 %v2557_v28 }
 0x8e6   : > { %v1502_v36 = vpop.f32.mrb[12].mxu1 }
 0x8e7   : > { %v3649_v37 = vadd.f32 %v1502_v36, %v3303_v1  ;;  %v2382_v38 = vpop.f32.mrb[13].mxu1  ;;  %v1639_v1 = vld [vmem:[%s3863_s10 + $0x70] sm:$0xff] }
 0x8e8   : > { %v2573_v44 = vpack.c.bf16 %v1639_v1, %v1637_v42  ;;  %v1760_v38 = vld [vmem:[#allocation10 + $0x80] sm:$0xff]  ;;  %v1745_v42 = vld [vmem:[#allocation10 + $0x8] sm:$0xff]  ;;  %v1762_v1 = vld [vmem:[#allocation10 + $0x90] sm:$0xff] }
 0x8e9   : > { %v1507_v39 = vmul.f32 %v3649_v37, %v3649_v37  ;;  %v2593_v43 = vpack.c.bf16 %v1745_v42, %v1744_v41 }
 0x8ea   : > { %2574 = vmatpush1.bf16.msra.mxu1 %v2573_v44  ;;  %v1763_v44 = vld [vmem:[#allocation10 + $0x98] sm:$0xff] }
 0x8eb   : > { %1508 = vadd.xlane.f32.xlu1 %v1507_v39  ;;  %2576 = vmatprep.subr.bf16.mxu1 %v2575_v53  ;;  %v1761_v39 = vld [vmem:[#allocation10 + $0x88] sm:$0xff]  ;;  %v2595_v45 = vpack.c.bf16 %v1763_v44, %v1762_v1  ;;  %v1748_v53 = vld [vmem:[#allocation10 + $0x20] sm:$0xff] }
 0x8ec   : > { %v2591_v40 = vpack.c.bf16 %v1761_v39, %v1760_v38  ;;  %v2601_v55 = vpack.c.bf16 %v1749_v54, %v1748_v53 }
 0x8ee   : > { %2578 = vmatpush1.bf16.msra.mxu1 %v2577_v0  ;;  %2592 = vmatprep.subr.bf16.mxu0 %v2591_v40  ;;  %v1767_v0 = vld [vmem:[#allocation10 + $0xb8] sm:$0xff] }
 0x8ef   : > { %2580 = vmatprep.subr.bf16.mxu1 %v2579_v63  ;;  %v2603_v57 = vpack.c.bf16 %v1767_v0, %v1766_v56  ;;  %v1752_v63 = vld [vmem:[#allocation10 + $0x40] sm:$0xff] }
 0x8f0   : > { %v2609_v4 = vpack.c.bf16 %v1753_v2, %v1752_v63 }
 0x8f2   : > { %2582 = vmatpush1.bf16.msra.mxu1 %v2581_v7  ;;  %v2611_v7 = vpack.c.bf16 %v1771_v6, %v1770_v5 }
 0x8f3   : > { %2584 = vmatprep.subr.bf16.mxu1 %v2583_v12  ;;  %v1773_v12 = vld [vmem:[#allocation10 + $0xe8] sm:$0xff] }
 0x8f4   : > { %v2615_v13 = vpack.c.bf16 %v1773_v12, %v1772_v11 }
 0x8f6   : > { %2586 = vmatpush1.bf16.msra.mxu1 %v2585_v19  ;;  %v1758_v19 = vld [vmem:[#allocation10 + $0x70] sm:$0xff] }
 0x8f7   : > { %2588 = vmatprep.subr.bf16.mxu1 %v2587_v24  ;;  %v2621_v21 = vpack.c.bf16 %v1759_v20, %v1758_v19 }
 0x8fa   : > { %2590 = vmatpush1.bf16.msra.mxu1 %v2589_v29 }
 0x978   : > { %v1509_v30 = vpop.xlane.xlu1 %1508 }
 0x979   : > { %v1510_v31 = vmul.f32 0.0078125, %v1509_v30 }
 0x97b   : > { %v1511_v32 = vadd.f32 1e-06, %v1510_v31 }
 0x97d   : > { %2737 = vrsqrt.f32 %v1511_v32 }
 0x987   : > { %v2738_v33 = vpop.eup %2737 }
 0x988   : > { %v1513_v35 = vmul.f32 %v2738_v33, %v3649_v37 }
 0x98a   : > { %v1521_v36 = vmul.f32 %v1997_v34, %v1513_v35 }
 0x98c   : > { %1619 = vmatmul.mubr.f32.vlgmr.msra.gmra.mrb[6].mxu0 %v1521_v36  ;;  %1722 = vmatmul.mubr.f32.vlgmr.msra.gmra.mrb[14].mxu1 %v1521_v36 }
 0x98d   : > { %2594 = vmatpush3.bf16.msra.mxu0 %v2593_v43 }
 0x98e   : > { %2596 = vmatprep.subr.bf16.mxu0 %v2595_v45 }
 0x991   : > { %2598 = vmatpush3.bf16.msra.mxu0 %v2597_v48 }
 0x992   : > { %2600 = vmatprep.subr.bf16.mxu0 %v2599_v52 }
 0x995   : > { %2602 = vmatpush3.bf16.msra.mxu0 %v2601_v55 }
 0x996   : > { %2604 = vmatprep.subr.bf16.mxu0 %v2603_v57 }
 0x999   : > { %2606 = vmatpush3.bf16.msra.mxu0 %v2605_v60 }
 0x99a   : > { %2608 = vmatprep.subr.bf16.mxu0 %v2607_v62 }
 0x99d   : > { %2610 = vmatpush3.bf16.msra.mxu0 %v2609_v4 }
 0x99e   : > { %2612 = vmatprep.subr.bf16.mxu0 %v2611_v7 }
 0x9a1   : > { %2614 = vmatpush3.bf16.msra.mxu0 %v2613_v10 }
 0x9a2   : > { %2616 = vmatprep.subr.bf16.mxu0 %v2615_v13 }
 0x9a5   : > { %2618 = vmatpush3.bf16.msra.mxu0 %v2617_v16 }
 0x9a6   : > { %2620 = vmatprep.subr.bf16.mxu0 %v2619_v18 }
 0x9a9   : > { %2622 = vmatpush3.bf16.msra.mxu0 %v2621_v21 }
 0xa5f   : > { %v1620_v22 = vpop.f32.mrb[6].mxu0  ;;  %v1723_v23 = vpop.f32.mrb[14].mxu1 }
 0xa60   : > { %v1998_v24 = vmul.f32 -1.442695, %v1620_v22  ;;  %v1622_v25 = vpop.f32.mrb[7].mxu0  ;;  %v1725_v26 = vpop.f32.mrb[15].mxu1 }
 0xa61   : > { %v1999_v27 = vmul.f32 -1.442695, %v1622_v25 }
 0xa62   : > { %2739 = vpow2.f32 %v1998_v24 }
 0xa63   : > { %2741 = vpow2.f32 %v1999_v27 }
 0xa6c   : > { %v2740_v28 = vpop.eup %2739 }
 0xa6d   : > { %v2742_v29 = vpop.eup %2741  ;;  %v1734_v30 = vadd.f32 1.0, %v2740_v28 }
 0xa6e   : > { %v1735_v31 = vadd.f32 1.0, %v2742_v29 }
 0xa6f   : > { %2743 = vrcp.f32 %v1734_v30 }
 0xa70   : > { %2745 = vrcp.f32 %v1735_v31 }
 0xa79   : > { %v2744_v32 = vpop.eup %2743 }
 0xa7a   : > { %v2746_v33 = vpop.eup %2745  ;;  %v1740_v34 = vmul.f32 %v2744_v32, %v1620_v22 }
 0xa7b   : > { %v1741_v35 = vmul.f32 %v2746_v33, %v1622_v25 }
 0xa7c   : > { %v1742_v36 = vmul.f32 %v1740_v34, %v1723_v23 }
 0xa7d   : > { %v1743_v38 = vmul.f32 %v1741_v35, %v1725_v26 }
 0xa7f   : > { %1840 = vmatprep.mubr.f32.mxu0 %v1743_v38 }
 0xa80   : > { %1841 = vmatmul.mubr.f32.vlgmr.msra.gmra.mrb[8].mxu0 %v1742_v36 }
 0xb53   : > { %v2150_v39 = vpop.f32.mrb[8].mxu0 }
 0xb54   : > { %v2151_v40 = vpop.f32.mrb[9].mxu0 }
 0xb55   : > { %v2152_v41 = vadd.f32 %v2151_v40, %v2150_v39 }
 0xb57   : > { %v1846_v42 = vadd.f32 %v2152_v41, %v3649_v37 }
 0xb59   : > { %1847 = vst [vmem:[%s540_s20] sm:$0xff] %v1846_v42 }
 0xb5a   : > { %2902 = shalt.err (!%p2899_p0)
}
 0xb5b   : > { %s2903_s2 = scalar_lea.hbm %s3772_s8, 128  ;;  %s2907_s23 = scalar_lea.hbm %s3866_s12, 256 }
 0xb5c   : > { %p2904_p2 = scmp.ne.s32.totalorder %s3772_s8, %s2903_s2  ;;  %p2908_p10 = scmp.lt.u32.totalorder %s3772_s8, %s3866_s12 }
 0xb5d   : > { %p2909_p11 = scmp.lt.u32.totalorder %s2907_s23, %s2903_s2  ;;  %p2911_p6 = scmp.lt.u32.totalorder %s2903_s2, %s3772_s8 }
 0xb5e   : > { %p2905_p8 = pnand %p2904_p2, %p3867_p5 }
 0xb5f   : > { %p2910_p1 = por %p2909_p11, %p2908_p10 }
 0xb60   : > { %p2906_p4 = pneg %p2905_p8 }
 0xb61   : > { %p2912_p7 = por %p2911_p6, %p2910_p1 }
 0xb63   : > { %p2913_p9 = pnand %p2912_p7, %p2906_p4 }
 0xb65   : > { %2916 = shalt.err (!%p2913_p9)
}
 0xb66   : > { %2641 = dma.vmem_to_hbm [thread:$0]  (%p3867_p5), %s3774_s18, 128, %s3772_s8, %s1849_s24  }
 0xb67 PF: > { %s1874_s14 = sand.u32 1, %s2951_s29   ;;  %p3868_p12 = scmp.ne.s32.totalorder %s3853_s17, 0 }
 0xb68   : > { %p3869_p3 = scmp.ge.s32.totalorder %s2963_s16, 2  ;;  %s1875_s22 = scalar_lea.sflag [#allocation4], %s1874_s14 }
 0xb6a   : > { %p2661_p13 = pnand %p3869_p3, %p3868_p12 }
 0xb6c   : > { %2946 = dma.done.wait (!%p2661_p13), %s1875_s22, 128  }
 0xb6d   : > { %2948 = vsyncadd (!%p2661_p13), %s1875_s22, 4294967168  ;;  %p29_p0 = scmp.ge.s32.totalorder %s3207_s21, 4   ;;  %s3870_s29 = smov %s2955_s30 }
 0xb6e   : > { %s3871_s30 = smov %s2959_s15  ;;  %s3872_s15 = smov %s3218_s27 }
 0xb6f   : > { %s3873_s16 = smov %s3207_s21  ;;  %31 = sbr.rel (!%p29_p0) target bundleno = 15 (0xf), region = 137 }
 0xb76   :  { %1880 = vsyncpa [#allocation3], 1 }
 0xb77   :  { %1882 = vsyncpa [#allocation3 + $0x1], 1 }
 0xb78   :  { %1883 = vsyncpa [#allocation6], 1 }
 0xb79   :  { %1884 = vsyncpa [#allocation9], 1 }
 0xb7a   :  { %1885 = vsyncpa [#allocation4], 1 }
 0xb7b   :  { %1887 = vsyncpa [#allocation4 + $0x1], 1 }

</bundles_post_ra>
